<compile_context>
chip_gen: v7x
topology: tpu7x:2x2x1
jax: 0.10.0
libtpu: 0.0.40
codegen_flags: <defaults>
</compile_context>

<pallas_src>
import jax
import jax.numpy as jnp
from jax.experimental import pallas as pl
from jax.experimental.pallas import tpu as pltpu


def _round_up(x, m):
    return (x + m - 1) // m * m


def _tpu_generation():
    """Best-effort TPU generation sniff ('v5' / 'v6' / 'v7' or None)."""
    try:
        kind = jax.devices()[0].device_kind.lower()
    except Exception:
        return None
    for g in ("v7", "v6", "v5"):
        if g in kind:
            return g
    return None


def _vmem_limit(estimate_bytes, gen):
    """Scoped-VMEM limit: at least the default, cover the estimate, stay under HW."""
    default_scoped = (16 << 20) if gen == "v5" else (32 << 20)
    cap = (56 << 20) if gen == "v7" else (110 << 20)
    return int(min(max(default_scoped, estimate_bytes + (4 << 20)), cap))


def _pick_hidden_chunk(H, cap):
    """Largest lane-aligned (multiple of 128) divisor of H that is <= cap."""
    best = 0
    d = 128
    while d <= min(cap, H):
        if H % d == 0:
            best = d
        d += 128
    if best:
        return best
    # TODO(synk): for H not a multiple of 128, pad H once in prepare_params
    # instead of falling back to a single whole-H chunk.
    return H


# --------------------------------------------------------------------------
# Kernels
# --------------------------------------------------------------------------
def ffn_resident_kernel(x_ref, w1_ref, b1_ref, w2_ref, b2_ref, o_ref):
    """Whole FFN for one row tile; w1/w2/b1/b2 stay VMEM-resident across grid.

    x_ref : (tm, C) bf16   w1_ref: (C, H) bf16   b1_ref: (1, H) f32
    w2_ref: (H, C) bf16    b2_ref: (1, C) f32    o_ref : (tm, C) x.dtype
    """
    h = jnp.dot(x_ref[...], w1_ref[...], preferred_element_type=jnp.float32)
    h = jnp.maximum(h + b1_ref[...], 0.0)
    y = jnp.dot(h.astype(jnp.bfloat16), w2_ref[...],
                preferred_element_type=jnp.float32)
    o_ref[...] = (y + b2_ref[...]).astype(o_ref.dtype)


def ffn_stream_kernel(x_ref, w1_ref, b1_ref, w2_ref, b2_ref, o_ref, acc_ref):
    """Hidden-dim-chunked FFN (weights streamed); acc_ref lives across k.

    x_ref : (tm, C) bf16   w1_ref: (C, th) bf16   b1_ref: (1, th) f32
    w2_ref: (th, C) bf16   b2_ref: (1, C)  f32
    o_ref : (tm, C) x.dtype   acc_ref: (tm, C) f32 scratch
    """
    k = pl.program_id(1)

    @pl.when(k == 0)
    def _():
        acc_ref[...] = jnp.zeros_like(acc_ref)

    h = jnp.dot(x_ref[...], w1_ref[...], preferred_element_type=jnp.float32)
    h = jnp.maximum(h + b1_ref[...], 0.0)
    acc_ref[...] += jnp.dot(h.astype(jnp.bfloat16), w2_ref[...],
                            preferred_element_type=jnp.float32)

    @pl.when(k == pl.num_programs(1) - 1)
    def _():
        o_ref[...] = (acc_ref[...] + b2_ref[...]).astype(o_ref.dtype)


# --------------------------------------------------------------------------
# Wrapper
# --------------------------------------------------------------------------
def prepare_params(w1, b1, w2, b2):
    """One-time (outside the hot path) weight prep: bf16 weights, f32 biases."""
    H = w1.shape[1]
    C = w2.shape[1]
    return (w1.astype(jnp.bfloat16),
            b1.reshape(1, H).astype(jnp.float32),
            w2.astype(jnp.bfloat16),
            b2.reshape(1, C).astype(jnp.float32))


def feed_forward(x, w1, b1, w2, b2, *, tm=None, th=None):
    """relu(x @ w1 + b1) @ w2 + b2.

    x : (B, T, C);  w1: (C, H) bf16;  b1: (1, H) f32;  w2: (H, C) bf16;
    b2: (1, C) f32.  Returns (B, T, C) in x.dtype.
    """
    B, T, C = x.shape
    H = w1.shape[1]
    M = B * T
    gen = _tpu_generation()
    out_dtype = x.dtype
    out_isz = jnp.dtype(out_dtype).itemsize

    # Slow-path fallbacks only; the fast path passes pre-cast params.
    if w1.dtype != jnp.bfloat16:
        w1 = w1.astype(jnp.bfloat16)
    if w2.dtype != jnp.bfloat16:
        w2 = w2.astype(jnp.bfloat16)
    b1 = b1.reshape(1, H).astype(jnp.float32)
    b2 = b2.reshape(1, C).astype(jnp.float32)

    x2d = x.reshape(M, C)
    if x2d.dtype != jnp.bfloat16:
        x2d = x2d.astype(jnp.bfloat16)  # bf16 MXU operands, f32 accumulation

    # Resident-weight path when both bf16 weight matrices fit a safe VMEM budget.
    weight_bytes = 2 * C * H * 2
    resident = (weight_bytes <= (8 << 20)) and (H <= 4096)

    # ---- row tile (multiple of 16 for bf16 sublane packing) ----------------
    if tm is None:
        # Streaming weights need a larger tm on v6e to clear its HBM roofline;
        # v7x/v5e stay at 256 (64 MiB / 16 MiB VMEM budgets respectively).
        tm = 256 if resident else (512 if gen == "v6" else 256)
    tm = max(16, min(_round_up(tm, 16), _round_up(M, 16)))
    # v7x has two TensorCores: make sure the parallel row axis has >= 2 tiles.
    if gen == "v7" and M >= 32 and pl.cdiv(M, tm) < 2:
        tm = _round_up(pl.cdiv(M, 2), 16)
    n_row_tiles = pl.cdiv(M, tm)  # ragged last tile is masked by Pallas

    if resident:
        vmem_est = (2 * tm * C * 2                 # x double-buffer (bf16)
                    + 2 * (C * H + H * C) * 2      # w1 + w2 (bf16)
                    + 2 * (H + C) * 4              # biases
                    + 2 * tm * C * out_isz)        # out double-buffer
        out2d = pl.pallas_call(
            ffn_resident_kernel,
            out_shape=jax.ShapeDtypeStruct((M, C), out_dtype),
            grid=(n_row_tiles,),
            in_specs=[
                pl.BlockSpec((tm, C), lambda i: (i, 0)),   # x row tile (streamed)
                pl.BlockSpec((C, H), lambda i: (0, 0)),    # w1 (resident)
                pl.BlockSpec((1, H), lambda i: (0, 0)),    # b1 (resident)
                pl.BlockSpec((H, C), lambda i: (0, 0)),    # w2 (resident)
                pl.BlockSpec((1, C), lambda i: (0, 0)),    # b2 (resident)
            ],
            out_specs=pl.BlockSpec((tm, C), lambda i: (i, 0)),
            compiler_params=pltpu.CompilerParams(
                dimension_semantics=("parallel",),
                vmem_limit_bytes=_vmem_limit(vmem_est, gen),
            ),
        )(x2d, w1, b1, w2, b2)
    else:
        # ---- streaming path: chunk the hidden dim (reduction axis last) ----
        if th is None:
            th = 512 if gen == "v6" else 256
        th = _pick_hidden_chunk(H, th)
        n_hidden = pl.cdiv(H, th)  # th divides H except the whole-H fallback

        # Deeper prefetch only for the re-fetched weight panels, only on v6e.
        wkw = dict(pipeline_mode=pl.Buffered(3)) if gen == "v6" else {}

        vmem_est = (2 * tm * C * 2                 # x
                    + 3 * (C * th + th * C) * 2    # w1/w2 panels (<=3 buffers)
                    + 2 * (th + C) * 4             # biases
                    + 2 * tm * C * out_isz         # out
                    + tm * C * 4)                  # f32 accumulator scratch
        out2d = pl.pallas_call(
            ffn_stream_kernel,
            out_shape=jax.ShapeDtypeStruct((M, C), out_dtype),
            grid=(n_row_tiles, n_hidden),
            in_specs=[
                pl.BlockSpec((tm, C), lambda i, k: (i, 0)),         # x row tile
                pl.BlockSpec((C, th), lambda i, k: (0, k), **wkw),  # w1 panel
                pl.BlockSpec((1, th), lambda i, k: (0, k)),         # b1 chunk
                pl.BlockSpec((th, C), lambda i, k: (k, 0), **wkw),  # w2 panel
                pl.BlockSpec((1, C), lambda i, k: (0, 0)),          # b2
            ],
            out_specs=pl.BlockSpec((tm, C), lambda i, k: (i, 0)),
            scratch_shapes=[pltpu.VMEM((tm, C), jnp.float32)],
            compiler_params=pltpu.CompilerParams(
                dimension_semantics=("parallel", "arbitrary"),
                vmem_limit_bytes=_vmem_limit(vmem_est, gen),
            ),
        )(x2d, w1, b1, w2, b2)

    return out2d.reshape(B, T, C)


def init_params(key, n_embed):
    """Deterministic init mimicking PyTorch nn.Linear default (+/- 1/sqrt(fan_in))."""
    k1, k2, k3, k4 = jax.random.split(key, 4)
    hidden = 4 * n_embed
    bound1 = 1.0 / jnp.sqrt(n_embed)
    bound2 = 1.0 / jnp.sqrt(hidden)
    # Stored as (in_features, out_features) so the kernel does x @ W.
    w1 = jax.random.uniform(k1, (n_embed, hidden), jnp.float32, -bound1, bound1)
    b1 = jax.random.uniform(k2, (hidden,), jnp.float32, -bound1, bound1)
    w2 = jax.random.uniform(k3, (hidden, n_embed), jnp.float32, -bound2, bound2)
    b2 = jax.random.uniform(k4, (n_embed,), jnp.float32, -bound2, bound2)
    return w1, b1, w2, b2


if __name__ == "__main__":
    n_embed = 384
    B, T = 2, 8

    key = jax.random.PRNGKey(0)
    kx, kp = jax.random.split(key)
    x = jax.random.normal(kx, (B, T, n_embed), jnp.float32)
    w1, b1, w2, b2 = init_params(kp, n_embed)

    # One-time weight prep outside the hot path (bf16 weights, f32 biases).
    params = prepare_params(w1, b1, w2, b2)

    fwd = jax.jit(feed_forward)
    out = jax.block_until_ready(fwd(x, *params))
    assert out.shape == (B, T, n_embed)
    assert out.dtype == x.dtype

    # Reference matching the kernel's numerics (bf16 operands, f32 accumulation).
    xb = x.reshape(-1, n_embed).astype(jnp.bfloat16)
    h_ref = jnp.maximum(
        jnp.dot(xb, params[0], preferred_element_type=jnp.float32) + b1, 0.0)
    ref = jnp.dot(h_ref.astype(jnp.bfloat16), params[2],
                  preferred_element_type=jnp.float32) + b2
    ref = ref.reshape(B, T, n_embed)
    assert jnp.allclose(out, ref, atol=5e-3, rtol=5e-3)

    # Looser sanity check against pure-f32 math (bf16 quantization error only).
    ref_f32 = jnp.maximum(x.reshape(-1, n_embed) @ w1 + b1, 0.0) @ w2 + b2
    assert jnp.allclose(out, ref_f32.reshape(B, T, n_embed), atol=5e-2, rtol=5e-2)

    print("KERNEL_OK")
</pallas_src>

<mosaic_0001>
module attributes {stable_mosaic.version = 11 : i64} {
  func.func @ffn_resident_kernel(%arg0: i32, %arg1: memref<16x384xbf16, #tpu.memory_space<vmem>>, %arg2: memref<384x1536xbf16, #tpu.memory_space<vmem>>, %arg3: memref<1x1536xf32, #tpu.memory_space<vmem>>, %arg4: memref<1536x384xbf16, #tpu.memory_space<vmem>>, %arg5: memref<1x384xf32, #tpu.memory_space<vmem>>, %arg6: memref<16x384xf32, #tpu.memory_space<vmem>>) attributes {dimension_semantics = [#tpu.dimension_semantics<parallel>], iteration_bounds = array<i64: 1>, scalar_prefetch = 0 : i64, scratch_operands = 0 : i64, tpu.core_type = #tpu.core_type<tc>, window_params = [{transform_indices = @transform_0, window_bounds = array<i64: 16, 384>}, {pipeline_mode = #tpu.pipeline_mode<synchronous>, transform_indices = @transform_1, window_bounds = array<i64: 384, 1536>}, {pipeline_mode = #tpu.pipeline_mode<synchronous>, transform_indices = @transform_2, window_bounds = array<i64: 1, 1536>}, {pipeline_mode = #tpu.pipeline_mode<synchronous>, transform_indices = @transform_3, window_bounds = array<i64: 1536, 384>}, {pipeline_mode = #tpu.pipeline_mode<synchronous>, transform_indices = @transform_4, window_bounds = array<i64: 1, 384>}, {transform_indices = @transform_5, window_bounds = array<i64: 16, 384>}]} {
    %c0 = arith.constant 0 : index
    %c0_0 = arith.constant 0 : index
    %0 = vector.load %arg1[%c0, %c0_0] : memref<16x384xbf16, #tpu.memory_space<vmem>>, vector<16x384xbf16>
    %c0_1 = arith.constant 0 : index
    %c0_2 = arith.constant 0 : index
    %1 = vector.load %arg2[%c0_1, %c0_2] : memref<384x1536xbf16, #tpu.memory_space<vmem>>, vector<384x1536xbf16>
    %cst = arith.constant dense<0.000000e+00> : vector<16x1536xf32>
    %2 = tpu.matmul %0, %1, %cst {dimension_numbers = #tpu.dot_dimension_numbers<[1], [0], [0], [1], [0, 0, 1, 1], [], []>} : vector<16x384xbf16>, vector<384x1536xbf16>, vector<16x1536xf32> -> vector<16x1536xf32>
    %c0_3 = arith.constant 0 : index
    %c0_4 = arith.constant 0 : index
    %3 = vector.load %arg3[%c0_3, %c0_4] : memref<1x1536xf32, #tpu.memory_space<vmem>>, vector<1x1536xf32>
    %4 = vector.broadcast %3 : vector<1x1536xf32> to vector<16x1536xf32>
    %5 = arith.addf %2, %4 : vector<16x1536xf32>
    %cst_5 = arith.constant 0.000000e+00 : f32
    %6 = vector.broadcast %cst_5 : f32 to vector<16x1536xf32>
    %7 = arith.maximumf %5, %6 : vector<16x1536xf32>
    %8 = arith.truncf %7 : vector<16x1536xf32> to vector<16x1536xbf16>
    %c0_6 = arith.constant 0 : index
    %c0_7 = arith.constant 0 : index
    %9 = vector.load %arg4[%c0_6, %c0_7] : memref<1536x384xbf16, #tpu.memory_space<vmem>>, vector<1536x384xbf16>
    %cst_8 = arith.constant dense<0.000000e+00> : vector<16x384xf32>
    %10 = tpu.matmul %8, %9, %cst_8 {dimension_numbers = #tpu.dot_dimension_numbers<[1], [0], [0], [1], [0, 0, 1, 1], [], []>} : vector<16x1536xbf16>, vector<1536x384xbf16>, vector<16x384xf32> -> vector<16x384xf32>
    %c0_9 = arith.constant 0 : index
    %c0_10 = arith.constant 0 : index
    %11 = vector.load %arg5[%c0_9, %c0_10] : memref<1x384xf32, #tpu.memory_space<vmem>>, vector<1x384xf32>
    %12 = vector.broadcast %11 : vector<1x384xf32> to vector<16x384xf32>
    %13 = arith.addf %10, %12 : vector<16x384xf32>
    %c0_11 = arith.constant 0 : index
    %c0_12 = arith.constant 0 : index
    %14 = vector.load %arg6[%c0_11, %c0_12] : memref<16x384xf32, #tpu.memory_space<vmem>>, vector<16x384xf32>
    tpu.vector_store %arg6[%c0_11, %c0_12], %13 {strides = array<i32>} : memref<16x384xf32, #tpu.memory_space<vmem>>, vector<16x384xf32>,
    return
  }
  func.func @transform_0(%arg0: i32) -> (i32, i32) {
    %c0_i32 = arith.constant 0 : i32
    %c0_i32_0 = arith.constant 0 : i32
    return %arg0, %c0_i32 : i32, i32
  }
  func.func @transform_1(%arg0: i32) -> (i32, i32) {
    %c0_i32 = arith.constant 0 : i32
    %c0_i32_0 = arith.constant 0 : i32
    %c0_i32_1 = arith.constant 0 : i32
    return %c0_i32, %c0_i32_0 : i32, i32
  }
  func.func @transform_2(%arg0: i32) -> (i32, i32) {
    %c0_i32 = arith.constant 0 : i32
    %c0_i32_0 = arith.constant 0 : i32
    %c0_i32_1 = arith.constant 0 : i32
    return %c0_i32, %c0_i32_0 : i32, i32
  }
  func.func @transform_3(%arg0: i32) -> (i32, i32) {
    %c0_i32 = arith.constant 0 : i32
    %c0_i32_0 = arith.constant 0 : i32
    %c0_i32_1 = arith.constant 0 : i32
    return %c0_i32, %c0_i32_0 : i32, i32
  }
  func.func @transform_4(%arg0: i32) -> (i32, i32) {
    %c0_i32 = arith.constant 0 : i32
    %c0_i32_0 = arith.constant 0 : i32
    %c0_i32_1 = arith.constant 0 : i32
    return %c0_i32, %c0_i32_0 : i32, i32
  }
  func.func @transform_5(%arg0: i32) -> (i32, i32) {
    %c0_i32 = arith.constant 0 : i32
    %c0_i32_0 = arith.constant 0 : i32
    return %arg0, %c0_i32 : i32, i32
  }
}

</mosaic_0001>

<bundles_post_ra>
// kernel: feed_forward.1
= control target key start
LH: loop header
LB: loop body
LE: loop exit
PB: predicated region body
PF: predicated region fallthrough
CT: control target
= control target key end

     0   :  { %10 = vsyncpa [#allocation3], 0  ;;  %s6882_s0 = inlined_call_operand.vmem [shape: bf16[16,384], index: 0, kind: input, shape index: {}]   ;;  %s6883_s1 = inlined_call_operand.hbm [shape: bf16[384,1536], index: 1, kind: input, shape index: {}]   ;;  %s6884_s2 = inlined_call_operand.hbm [shape: f32[1,1536], index: 2, kind: input, shape index: {}]   ;;  %s6885_s3 = inlined_call_operand.hbm [shape: bf16[1536,384], index: 3, kind: input, shape index: {}]   ;;  %s6886_s4 = inlined_call_operand.hbm [shape: f32[1,384], index: 4, kind: input, shape index: {}]   ;;  %s6887_s5 = inlined_call_operand.hbm [shape: f32[16,384], index: 5, kind: output, shape index: {}]  }
   0x1   :  { %11 = vsyncpa [#allocation6], 0 }
   0x2   :  { %12 = vsyncpa [#allocation9], 0 }
   0x3   :  { %13 = vsyncpa [#allocation4], 0  ;;  %s6640_s18 = smov [#allocation5]   ;;  %s6641_s20 = smov [#allocation2]  }
   0x4   :  { %s34_s19 = sshll.u32 %s6640_s18, 4  ;;  %s21_s21 = sshll.u32 %s6641_s20, 4  ;;  %s35_s19 = int_to_ptr.vmem [resolvable:$true] %s34_s19  ;;  %s6682_s21 = int_to_ptr.vmem [resolvable:$true] %s21_s21 }
   0x5   :  { %s6522_s24 = scalar_lea.hbm %s6884_s2, 192 }
   0x6   :  { %p6523_p0 = scmp.ne.s32.totalorder %s6884_s2, %s6522_s24  ;;  %p6526_p1 = scmp.lt.u32.totalorder %s6522_s24, %s6884_s2 }
   0x8   :  { %p6528_p2 = pnand %p6526_p1, %p6523_p0 }
   0xa   :  { %6531 = shalt.err (!%p6528_p2)
}
   0xb   :  { %s6532_s29 = scalar_lea.vmem %s35_s19, 192  ;;  %p6537_p4 = scmp.lt.s32.totalorder %s35_s19, %s35_s19 }
   0xc   :  { %p6533_p3 = scmp.ne.s32.totalorder %s35_s19, %s6532_s29  ;;  %p6538_p5 = scmp.lt.s32.totalorder %s6532_s29, %s6532_s29 }
   0xe   :  { %p6539_p6 = por %p6538_p5, %p6537_p4 }
  0x10   :  { %p6540_p7 = pnand %p6539_p6, %p6533_p3 }
  0x12   :  { %6543 = shalt.err (!%p6540_p7)
}
  0x13   :  { %37 = dma.hbm_to_vmem [thread:$0]  %s6884_s2, 192, %s35_s19, [#allocation6]  }
  0x14   :  { %s6544_s9 = scalar_lea.hbm %s6883_s1, 36864 }
  0x15   :  { %p6545_p8 = scmp.ne.s32.totalorder %s6883_s1, %s6544_s9  ;;  %p6548_p9 = scmp.lt.u32.totalorder %s6544_s9, %s6883_s1 }
  0x17   :  { %p6550_p10 = pnand %p6548_p9, %p6545_p8 }
  0x19   :  { %6553 = shalt.err (!%p6550_p10)
}
  0x1a   :  { %s6554_s14 = scalar_lea.vmem %s6682_s21, 36864  ;;  %p6559_p12 = scmp.lt.s32.totalorder %s6682_s21, %s6682_s21 }
  0x1b   :  { %p6555_p11 = scmp.ne.s32.totalorder %s6682_s21, %s6554_s14  ;;  %p6560_p13 = scmp.lt.s32.totalorder %s6554_s14, %s6554_s14 }
  0x1d   :  { %p6561_p0 = por %p6560_p13, %p6559_p12 }
  0x1f   :  { %p6562_p1 = pnand %p6561_p0, %p6555_p11 }
  0x21   :  { %6565 = shalt.err (!%p6562_p1)
}
  0x22   :  { %s6642_s2 = smov 768   ;;  %s6643_s15 = smov 48  }
  0x23   :  { %27 = dma.hbm_to_vmem [thread:$0]  %s6883_s1, 36864, %s6682_s21, [#allocation3], %s6642_s2, %s6642_s2, %s6643_s15  }
  0x24   :  { %s6644_s18 = smov [#allocation7]   ;;  %s6566_s23 = scalar_lea.hbm %s6885_s3, 36864 }
  0x25   :  { %s43_s19 = sshll.u32 %s6644_s18, 4  ;;  %p6567_p2 = scmp.ne.s32.totalorder %s6885_s3, %s6566_s23  ;;  %s44_s19 = int_to_ptr.vmem [resolvable:$true] %s43_s19 }
  0x26   :  { %p6570_p3 = scmp.lt.u32.totalorder %s6566_s23, %s6885_s3 }
  0x28   :  { %p6572_p4 = pnand %p6570_p3, %p6567_p2 }
  0x2a   :  { %6575 = shalt.err (!%p6572_p4)
}
  0x2b   :  { %s6576_s28 = scalar_lea.vmem %s44_s19, 36864  ;;  %p6581_p6 = scmp.lt.s32.totalorder %s44_s19, %s44_s19 }
  0x2c   :  { %p6577_p5 = scmp.ne.s32.totalorder %s44_s19, %s6576_s28  ;;  %p6582_p7 = scmp.lt.s32.totalorder %s6576_s28, %s6576_s28 }
  0x2e   :  { %p6583_p8 = por %p6582_p7, %p6581_p6 }
  0x30   :  { %p6584_p9 = pnand %p6583_p8, %p6577_p5 }
  0x32   :  { %6587 = shalt.err (!%p6584_p9)
}
  0x33   :  { %s6645_s1 = smov 192   ;;  %s6646_s21 = smov 12  }
  0x34   :  { %49 = dma.hbm_to_vmem [thread:$0]  %s6885_s3, 36864, %s44_s19, [#allocation6], %s6645_s1, %s6645_s1, %s6646_s21  }
  0x35   :  { %s6647_s6 = smov [#allocation8]   ;;  %s6588_s10 = scalar_lea.hbm %s6886_s4, 48 }
  0x36   :  { %s56_s7 = sshll.u32 %s6647_s6, 4  ;;  %p6589_p10 = scmp.ne.s32.totalorder %s6886_s4, %s6588_s10  ;;  %s57_s7 = int_to_ptr.vmem [resolvable:$true] %s56_s7 }
  0x37   :  { %p6592_p11 = scmp.lt.u32.totalorder %s6588_s10, %s6886_s4 }
  0x39   :  { %p6594_p12 = pnand %p6592_p11, %p6589_p10 }
  0x3b   :  { %6597 = shalt.err (!%p6594_p12)
}
  0x3c   :  { %s6598_s2 = scalar_lea.vmem %s57_s7, 48  ;;  %s6602_s3 = scalar_lea.vmem %s57_s7, 64 }
  0x3d   :  { %p6599_p13 = scmp.ne.s32.totalorder %s57_s7, %s6598_s2  ;;  %p6603_p0 = scmp.lt.s32.totalorder %s57_s7, %s57_s7 }
  0x3e   :  { %p6604_p1 = scmp.lt.s32.totalorder %s6602_s3, %s6598_s2 }
  0x40   :  { %p6605_p2 = por %p6604_p1, %p6603_p0 }
  0x42   :  { %p6606_p3 = pnand %p6605_p2, %p6599_p13 }
  0x44   :  { %6609 = shalt.err (!%p6606_p3)
}
  0x45   :  { %59 = dma.hbm_to_vmem [thread:$0]  %s6886_s4, 48, %s57_s7, [#allocation9]  }
  0x46   :  { %6632 = dma.done.wait [#allocation3], 36864  }
  0x47   :  { %6633 = vsyncadd [#allocation3], 4294930432 }
  0x48   :  { %6634 = dma.done.wait [#allocation6], 37056  }
  0x49   :  { %6635 = vsyncadd [#allocation6], 4294930240 }
  0x4a   :  { %6636 = dma.done.wait [#allocation9], 48  }
  0x4b   :  { %6637 = vsyncadd [#allocation9], 4294967248  ;;  %v5698_v0 = vld [vmem:[#allocation2 + $0x4] ss:$48 sps:$4 sm:$0xff]   ;;  %v5700_v1 = vld [vmem:[#allocation2] ss:$48 sps:$4 sm:$0xff]  }
  0x4c   :  { %1885 = vmatprep.subr.bf16.mxu1 %v5698_v0  ;;  %v5701_v2 = vld [vmem:[#allocation2 + $0x64] ss:$48 sps:$4 sm:$0xff]   ;;  %v5703_v3 = vld [vmem:[#allocation2 + $0x60] ss:$48 sps:$4 sm:$0xff]   ;;  %v6740_v18 = vld [vmem:[%s6882_s0 + $0x4] ss:$12 sps:$4 sm:$0xff]  }
  0x4d   :  { %1886 = vmatpush1.bf16.msra.mxu1 %v5700_v1  ;;  %v5704_v4 = vld [vmem:[#allocation2 + $0xc4] ss:$48 sps:$4 sm:$0xff]   ;;  %v5706_v5 = vld [vmem:[#allocation2 + $0xc0] ss:$48 sps:$4 sm:$0xff]   ;;  %1917 = vmatprep.mubr.bf16.mxu1 %v6740_v18  ;;  %v6648_v63 = vmov 0  }
  0x4e   :  { %1887 = vmatprep.subr.bf16.mxu1 %v5701_v2  ;;  %v5707_v6 = vld [vmem:[#allocation2 + $0x124] ss:$48 sps:$4 sm:$0xff]   ;;  %v5709_v7 = vld [vmem:[#allocation2 + $0x120] ss:$48 sps:$4 sm:$0xff]   ;;  %2089 = vmatprep.mubr.bf16.mxu0 %v6740_v18 }
  0x4f   :  { %v5710_v8 = vld [vmem:[#allocation2 + $0x184] ss:$48 sps:$4 sm:$0xff]   ;;  %v5712_v9 = vld [vmem:[#allocation2 + $0x180] ss:$48 sps:$4 sm:$0xff]  }
  0x50   :  { %v5713_v10 = vld [vmem:[#allocation2 + $0x1e4] ss:$48 sps:$4 sm:$0xff]   ;;  %v5715_v11 = vld [vmem:[#allocation2 + $0x1e0] ss:$48 sps:$4 sm:$0xff]  }
  0x51   :  { %1888 = vmatpush1.bf16.msra.mxu1 %v5703_v3  ;;  %v5716_v12 = vld [vmem:[#allocation2 + $0x244] ss:$48 sps:$4 sm:$0xff]   ;;  %v5718_v14 = vld [vmem:[#allocation2 + $0x240] ss:$48 sps:$4 sm:$0xff]  }
  0x52   :  { %1889 = vmatprep.subr.bf16.mxu1 %v5704_v4  ;;  %v5743_v13 = vld [vmem:[#allocation2 + $0x14] ss:$48 sps:$4 sm:$0xff]   ;;  %v5747_v16 = vld [vmem:[#allocation2 + $0x10] ss:$48 sps:$4 sm:$0xff]  }
  0x53   :  { %v5719_v15 = vld [vmem:[#allocation2 + $0x2a4] ss:$48 sps:$4 sm:$0xff]   ;;  %2057 = vmatprep.subr.bf16.mxu0 %v5743_v13  ;;  %v5721_v19 = vld [vmem:[#allocation2 + $0x2a0] ss:$48 sps:$4 sm:$0xff]  }
  0x54   :  { %v5749_v17 = vld [vmem:[#allocation2 + $0x74] ss:$48 sps:$4 sm:$0xff]   ;;  %2058 = vmatpush1.bf16.msra.mxu0 %v5747_v16  ;;  %v5756_v20 = vld [vmem:[#allocation2 + $0x70] ss:$48 sps:$4 sm:$0xff]  }
  0x55   :  { %1890 = vmatpush1.bf16.msra.mxu1 %v5706_v5  ;;  %2059 = vmatprep.subr.bf16.mxu0 %v5749_v17  ;;  %v5758_v21 = vld [vmem:[#allocation2 + $0xd4] ss:$48 sps:$4 sm:$0xff]   ;;  %v5763_v23 = vld [vmem:[#allocation2 + $0xd0] ss:$48 sps:$4 sm:$0xff]  }
  0x56   :  { %1891 = vmatprep.subr.bf16.mxu1 %v5707_v6  ;;  %v5722_v22 = vld [vmem:[#allocation2 + $0x304] ss:$48 sps:$4 sm:$0xff]   ;;  %v5724_v25 = vld [vmem:[#allocation2 + $0x300] ss:$48 sps:$4 sm:$0xff]  }
  0x57   :  { %v5764_v24 = vld [vmem:[#allocation2 + $0x134] ss:$48 sps:$4 sm:$0xff]   ;;  %v5769_v27 = vld [vmem:[#allocation2 + $0x130] ss:$48 sps:$4 sm:$0xff]  }
  0x58   :  { %2060 = vmatpush1.bf16.msra.mxu0 %v5756_v20  ;;  %v5725_v26 = vld [vmem:[#allocation2 + $0x364] ss:$48 sps:$4 sm:$0xff]   ;;  %v5727_v29 = vld [vmem:[#allocation2 + $0x360] ss:$48 sps:$4 sm:$0xff]  }
  0x59   :  { %1892 = vmatpush1.bf16.msra.mxu1 %v5709_v7  ;;  %2061 = vmatprep.subr.bf16.mxu0 %v5758_v21  ;;  %v5770_v28 = vld [vmem:[#allocation2 + $0x194] ss:$48 sps:$4 sm:$0xff]   ;;  %v5775_v31 = vld [vmem:[#allocation2 + $0x190] ss:$48 sps:$4 sm:$0xff]  }
  0x5a   :  { %1893 = vmatprep.subr.bf16.mxu1 %v5710_v8  ;;  %v5728_v30 = vld [vmem:[#allocation2 + $0x3c4] ss:$48 sps:$4 sm:$0xff]   ;;  %v5730_v33 = vld [vmem:[#allocation2 + $0x3c0] ss:$48 sps:$4 sm:$0xff]  }
  0x5b   :  { %v5776_v32 = vld [vmem:[#allocation2 + $0x1f4] ss:$48 sps:$4 sm:$0xff]   ;;  %v5781_v35 = vld [vmem:[#allocation2 + $0x1f0] ss:$48 sps:$4 sm:$0xff]  }
  0x5c   :  { %2062 = vmatpush1.bf16.msra.mxu0 %v5763_v23  ;;  %v5731_v34 = vld [vmem:[#allocation2 + $0x424] ss:$48 sps:$4 sm:$0xff]   ;;  %v5733_v37 = vld [vmem:[#allocation2 + $0x420] ss:$48 sps:$4 sm:$0xff]  }
  0x5d   :  { %1894 = vmatpush1.bf16.msra.mxu1 %v5712_v9  ;;  %2063 = vmatprep.subr.bf16.mxu0 %v5764_v24  ;;  %v5782_v36 = vld [vmem:[#allocation2 + $0x254] ss:$48 sps:$4 sm:$0xff]   ;;  %v5787_v39 = vld [vmem:[#allocation2 + $0x250] ss:$48 sps:$4 sm:$0xff]  }
  0x5e   :  { %1895 = vmatprep.subr.bf16.mxu1 %v5713_v10  ;;  %v5734_v38 = vld [vmem:[#allocation2 + $0x484] ss:$48 sps:$4 sm:$0xff]   ;;  %v5736_v41 = vld [vmem:[#allocation2 + $0x480] ss:$48 sps:$4 sm:$0xff]  }
  0x5f   :  { %v5788_v40 = vld [vmem:[#allocation2 + $0x2b4] ss:$48 sps:$4 sm:$0xff]   ;;  %v5793_v43 = vld [vmem:[#allocation2 + $0x2b0] ss:$48 sps:$4 sm:$0xff]  }
  0x60   :  { %2064 = vmatpush1.bf16.msra.mxu0 %v5769_v27  ;;  %v5737_v42 = vld [vmem:[#allocation2 + $0x4e4] ss:$48 sps:$4 sm:$0xff]   ;;  %v5739_v45 = vld [vmem:[#allocation2 + $0x4e0] ss:$48 sps:$4 sm:$0xff]  }
  0x61   :  { %1896 = vmatpush1.bf16.msra.mxu1 %v5715_v11  ;;  %2065 = vmatprep.subr.bf16.mxu0 %v5770_v28  ;;  %v5794_v44 = vld [vmem:[#allocation2 + $0x314] ss:$48 sps:$4 sm:$0xff]   ;;  %v5799_v47 = vld [vmem:[#allocation2 + $0x310] ss:$48 sps:$4 sm:$0xff]  }
  0x62   :  { %1897 = vmatprep.subr.bf16.mxu1 %v5716_v12  ;;  %v5740_v46 = vld [vmem:[#allocation2 + $0x544] ss:$48 sps:$4 sm:$0xff]   ;;  %v5742_v49 = vld [vmem:[#allocation2 + $0x540] ss:$48 sps:$4 sm:$0xff]  }
  0x63   :  { %v5800_v48 = vld [vmem:[#allocation2 + $0x374] ss:$48 sps:$4 sm:$0xff]   ;;  %v5806_v51 = vld [vmem:[#allocation2 + $0x370] ss:$48 sps:$4 sm:$0xff]  }
  0x64   :  { %2066 = vmatpush1.bf16.msra.mxu0 %v5775_v31  ;;  %v5745_v50 = vld [vmem:[#allocation2 + $0x5a4] ss:$48 sps:$4 sm:$0xff]   ;;  %v5748_v53 = vld [vmem:[#allocation2 + $0x5a0] ss:$48 sps:$4 sm:$0xff]  }
  0x65   :  { %1898 = vmatpush1.bf16.msra.mxu1 %v5718_v14  ;;  %2067 = vmatprep.subr.bf16.mxu0 %v5776_v32  ;;  %v5807_v52 = vld [vmem:[#allocation2 + $0x3d4] ss:$48 sps:$4 sm:$0xff]   ;;  %v5812_v55 = vld [vmem:[#allocation2 + $0x3d0] ss:$48 sps:$4 sm:$0xff]  }
  0x66   :  { %1899 = vmatprep.subr.bf16.mxu1 %v5719_v15  ;;  %v5755_v54 = vld [vmem:[#allocation2 + $0x604] ss:$48 sps:$4 sm:$0xff]   ;;  %v5753_v58 = vld [vmem:[#allocation2 + $0x600] ss:$48 sps:$4 sm:$0xff]  }
  0x67   :  { %v5813_v56 = vld [vmem:[#allocation2 + $0x434] ss:$48 sps:$4 sm:$0xff]   ;;  %v5818_v60 = vld [vmem:[#allocation2 + $0x430] ss:$48 sps:$4 sm:$0xff]  }
  0x68   :  { %2068 = vmatpush1.bf16.msra.mxu0 %v5781_v35  ;;  %v6747_v57 = vld [vmem:[%s6882_s0] ss:$12 sps:$4 sm:$0xff]   ;;  %v5760_v62 = vld [vmem:[#allocation2 + $0x660] ss:$48 sps:$4 sm:$0xff]  }
  0x69   :  { %1900 = vmatpush1.bf16.msra.mxu1 %v5721_v19  ;;  %2069 = vmatprep.subr.bf16.mxu0 %v5782_v36  ;;  %v5762_v59 = vld [vmem:[#allocation2 + $0x664] ss:$48 sps:$4 sm:$0xff]   ;;  %v5824_v1 = vld [vmem:[#allocation2 + $0x490] ss:$48 sps:$4 sm:$0xff]  }
  0x6a   :  { %1901 = vmatprep.subr.bf16.mxu1 %v5722_v22  ;;  %v5819_v61 = vld [vmem:[#allocation2 + $0x494] ss:$48 sps:$4 sm:$0xff]   ;;  %v5766_v3 = vld [vmem:[#allocation2 + $0x6c0] ss:$48 sps:$4 sm:$0xff]  }
  0x6b   :  { %v5768_v0 = vld [vmem:[#allocation2 + $0x6c4] ss:$48 sps:$4 sm:$0xff]   ;;  %v5830_v5 = vld [vmem:[#allocation2 + $0x4f0] ss:$48 sps:$4 sm:$0xff]  }
  0x6c   :  { %2070 = vmatpush1.bf16.msra.mxu0 %v5787_v39  ;;  %v5825_v2 = vld [vmem:[#allocation2 + $0x4f4] ss:$48 sps:$4 sm:$0xff]   ;;  %v5772_v7 = vld [vmem:[#allocation2 + $0x720] ss:$48 sps:$4 sm:$0xff]  }
  0x6d   :  { %1902 = vmatpush1.bf16.msra.mxu1 %v5724_v25  ;;  %2071 = vmatprep.subr.bf16.mxu0 %v5788_v40  ;;  %v5774_v4 = vld [vmem:[#allocation2 + $0x724] ss:$48 sps:$4 sm:$0xff]   ;;  %v5836_v9 = vld [vmem:[#allocation2 + $0x550] ss:$48 sps:$4 sm:$0xff]   ;;  %v5805_v25 = vld [vmem:[#allocation2 + $0xc] ss:$48 sps:$4 sm:$0xff]  }
  0x6e   :  { %1903 = vmatprep.subr.bf16.mxu1 %v5725_v26  ;;  %v5831_v6 = vld [vmem:[#allocation2 + $0x554] ss:$48 sps:$4 sm:$0xff]   ;;  %v5778_v11 = vld [vmem:[#allocation2 + $0x780] ss:$48 sps:$4 sm:$0xff]  }
  0x6f   :  { %v5780_v8 = vld [vmem:[#allocation2 + $0x784] ss:$48 sps:$4 sm:$0xff]   ;;  %v5842_v13 = vld [vmem:[#allocation2 + $0x5b0] ss:$48 sps:$4 sm:$0xff]  }
  0x70   :  { %2072 = vmatpush1.bf16.msra.mxu0 %v5793_v43  ;;  %v5837_v10 = vld [vmem:[#allocation2 + $0x5b4] ss:$48 sps:$4 sm:$0xff]   ;;  %v5784_v15 = vld [vmem:[#allocation2 + $0x7e0] ss:$48 sps:$4 sm:$0xff]  }
  0x71   :  { %1904 = vmatpush1.bf16.msra.mxu1 %v5727_v29  ;;  %2073 = vmatprep.subr.bf16.mxu0 %v5794_v44  ;;  %v5786_v12 = vld [vmem:[#allocation2 + $0x7e4] ss:$48 sps:$4 sm:$0xff]   ;;  %v5843_v17 = vld [vmem:[#allocation2 + $0x610] ss:$48 sps:$4 sm:$0xff]   ;;  %v5803_v29 = vld [vmem:[#allocation2 + $0x8] ss:$48 sps:$4 sm:$0xff]  }
  0x72   :  { %1905 = vmatprep.subr.bf16.mxu1 %v5728_v30  ;;  %v5845_v14 = vld [vmem:[#allocation2 + $0x614] ss:$48 sps:$4 sm:$0xff]   ;;  %v5790_v20 = vld [vmem:[#allocation2 + $0x840] ss:$48 sps:$4 sm:$0xff]   ;;  %v5811_v30 = vld [vmem:[#allocation2 + $0x6c] ss:$48 sps:$4 sm:$0xff]  }
  0x73   :  { %v5792_v16 = vld [vmem:[#allocation2 + $0x844] ss:$48 sps:$4 sm:$0xff]   ;;  %v5849_v22 = vld [vmem:[#allocation2 + $0x670] ss:$48 sps:$4 sm:$0xff]  }
  0x74   :  { %2074 = vmatpush1.bf16.msra.mxu0 %v5799_v47  ;;  %v5851_v19 = vld [vmem:[#allocation2 + $0x674] ss:$48 sps:$4 sm:$0xff]   ;;  %v5796_v24 = vld [vmem:[#allocation2 + $0x8a0] ss:$48 sps:$4 sm:$0xff]  }
  0x75   :  { %1906 = vmatpush1.bf16.msra.mxu1 %v5730_v33  ;;  %2075 = vmatprep.subr.bf16.mxu0 %v5800_v48  ;;  %v5798_v21 = vld [vmem:[#allocation2 + $0x8a4] ss:$48 sps:$4 sm:$0xff]   ;;  %v5855_v26 = vld [vmem:[#allocation2 + $0x6d0] ss:$48 sps:$4 sm:$0xff]   ;;  %v5809_v33 = vld [vmem:[#allocation2 + $0x68] ss:$48 sps:$4 sm:$0xff]  }
  0x76   :  { %1907 = vmatprep.subr.bf16.mxu1 %v5731_v34  ;;  %v5857_v23 = vld [vmem:[#allocation2 + $0x6d4] ss:$48 sps:$4 sm:$0xff]   ;;  %v6756_v28 = vld [vmem:[%s6882_s0 + $0x8] ss:$12 sps:$4 sm:$0xff]  }
  0x77   :  { %v5863_v27 = vld [vmem:[#allocation2 + $0x734] ss:$48 sps:$4 sm:$0xff]   ;;  %v5861_v31 = vld [vmem:[#allocation2 + $0x730] ss:$48 sps:$4 sm:$0xff]   ;;  %v5817_v34 = vld [vmem:[#allocation2 + $0xcc] ss:$48 sps:$4 sm:$0xff]  }
  0x78   :  { %2076 = vmatpush1.bf16.msra.mxu0 %v5806_v51  ;;  %v5869_v32 = vld [vmem:[#allocation2 + $0x794] ss:$48 sps:$4 sm:$0xff]   ;;  %v5867_v35 = vld [vmem:[#allocation2 + $0x790] ss:$48 sps:$4 sm:$0xff]  }
  0x79   :  { %1908 = vmatpush1.bf16.msra.mxu1 %v5733_v37  ;;  %2077 = vmatprep.subr.bf16.mxu0 %v5807_v52  ;;  %v5875_v36 = vld [vmem:[#allocation2 + $0x7f4] ss:$48 sps:$4 sm:$0xff]   ;;  %v5815_v37 = vld [vmem:[#allocation2 + $0xc8] ss:$48 sps:$4 sm:$0xff]   ;;  %v5873_v39 = vld [vmem:[#allocation2 + $0x7f0] ss:$48 sps:$4 sm:$0xff]  }
  0x7a   :  { %1909 = vmatprep.subr.bf16.mxu1 %v5734_v38  ;;  %v5823_v38 = vld [vmem:[#allocation2 + $0x12c] ss:$48 sps:$4 sm:$0xff]   ;;  %v5881_v40 = vld [vmem:[#allocation2 + $0x854] ss:$48 sps:$4 sm:$0xff]   ;;  %v5879_v43 = vld [vmem:[#allocation2 + $0x850] ss:$48 sps:$4 sm:$0xff]  }
  0x7b   :  { %v5887_v44 = vld [vmem:[#allocation2 + $0x8b4] ss:$48 sps:$4 sm:$0xff]   ;;  %v5885_v47 = vld [vmem:[#allocation2 + $0x8b0] ss:$48 sps:$4 sm:$0xff]  }
  0x7c   :  { %2078 = vmatpush1.bf16.msra.mxu0 %v5812_v55  ;;  %v5893_v48 = vld [vmem:[#allocation2 + $0x24] ss:$48 sps:$4 sm:$0xff]   ;;  %v5891_v51 = vld [vmem:[#allocation2 + $0x20] ss:$48 sps:$4 sm:$0xff]  }
  0x7d   :  { %1910 = vmatpush1.bf16.msra.mxu1 %v5736_v41  ;;  %2079 = vmatprep.subr.bf16.mxu0 %v5813_v56  ;;  %v5821_v41 = vld [vmem:[#allocation2 + $0x128] ss:$48 sps:$4 sm:$0xff]   ;;  %v5899_v52 = vld [vmem:[#allocation2 + $0x84] ss:$48 sps:$4 sm:$0xff]   ;;  %v5897_v55 = vld [vmem:[#allocation2 + $0x80] ss:$48 sps:$4 sm:$0xff]  }
  0x7e   :  { %1911 = vmatprep.subr.bf16.mxu1 %v5737_v42  ;;  %v5829_v42 = vld [vmem:[#allocation2 + $0x18c] ss:$48 sps:$4 sm:$0xff]   ;;  %v5905_v56 = vld [vmem:[#allocation2 + $0xe4] ss:$48 sps:$4 sm:$0xff]  }
  0x80   :  { %2080 = vmatpush1.bf16.msra.mxu0 %v5818_v60  ;;  %v5903_v60 = vld [vmem:[#allocation2 + $0xe0] ss:$48 sps:$4 sm:$0xff]  }
  0x81   :  { %1912 = vmatpush1.bf16.msra.mxu1 %v5739_v45  ;;  %2081 = vmatprep.subr.bf16.mxu0 %v5819_v61  ;;  %v5827_v45 = vld [vmem:[#allocation2 + $0x188] ss:$48 sps:$4 sm:$0xff]   ;;  %v5911_v61 = vld [vmem:[#allocation2 + $0x144] ss:$48 sps:$4 sm:$0xff]  }
  0x82   :  { %1913 = vmatprep.subr.bf16.mxu1 %v5740_v46  ;;  %v5835_v46 = vld [vmem:[#allocation2 + $0x1ec] ss:$48 sps:$4 sm:$0xff]  }
  0x84   :  { %2082 = vmatpush1.bf16.msra.mxu0 %v5824_v1  ;;  %v5909_v1 = vld [vmem:[#allocation2 + $0x140] ss:$48 sps:$4 sm:$0xff]  }
  0x85   :  { %1914 = vmatpush1.bf16.msra.mxu1 %v5742_v49  ;;  %2083 = vmatprep.subr.bf16.mxu0 %v5825_v2  ;;  %v5833_v49 = vld [vmem:[#allocation2 + $0x1e8] ss:$48 sps:$4 sm:$0xff]   ;;  %v5917_v2 = vld [vmem:[#allocation2 + $0x1a4] ss:$48 sps:$4 sm:$0xff]  }
  0x86   :  { %1915 = vmatprep.subr.bf16.mxu1 %v5745_v50  ;;  %v5841_v50 = vld [vmem:[#allocation2 + $0x24c] ss:$48 sps:$4 sm:$0xff]  }
  0x88   :  { %2084 = vmatpush1.bf16.msra.mxu0 %v5830_v5  ;;  %v5923_v5 = vld [vmem:[#allocation2 + $0x204] ss:$48 sps:$4 sm:$0xff]  }
  0x89   :  { %1916 = vmatpush1.bf16.msra.mxu1 %v5748_v53  ;;  %2085 = vmatprep.subr.bf16.mxu0 %v5831_v6  ;;  %v5839_v53 = vld [vmem:[#allocation2 + $0x248] ss:$48 sps:$4 sm:$0xff]  }
  0x8a   :  { %1928 = vmatprep.subr.bf16.mxu1 %v5755_v54  ;;  %v5848_v54 = vld [vmem:[#allocation2 + $0x2ac] ss:$48 sps:$4 sm:$0xff]   ;;  %v5864_v6 = vld [vmem:[#allocation2 + $0x3c8] ss:$48 sps:$4 sm:$0xff]  }
  0x8c   :  { %1918 = vmatmul.mubr.bf16.vlgmr.msra.gmra.mrb[0].mxu1 %v6747_v57  ;;  %2086 = vmatpush1.bf16.msra.mxu0 %v5836_v9  ;;  %v5929_v9 = vld [vmem:[#allocation2 + $0x264] ss:$48 sps:$4 sm:$0xff]  }
  0x8d   :  { %1929 = vmatpush1.bf16.msra.mxu1 %v5753_v58  ;;  %1960 = vmatprep.mubr.bf16.mxu1 %v6648_v63  ;;  %v5846_v58 = vld [vmem:[#allocation2 + $0x2a8] ss:$48 sps:$4 sm:$0xff]  }
  0x8e   :  { %1930 = vmatprep.subr.bf16.mxu1 %v5762_v59  ;;  %2087 = vmatprep.subr.bf16.mxu0 %v5837_v10  ;;  %v5854_v59 = vld [vmem:[#allocation2 + $0x30c] ss:$48 sps:$4 sm:$0xff]   ;;  %v5870_v10 = vld [vmem:[#allocation2 + $0x428] ss:$48 sps:$4 sm:$0xff]  }
  0x90   :  { %2088 = vmatpush1.bf16.msra.mxu0 %v5842_v13  ;;  %v5935_v13 = vld [vmem:[#allocation2 + $0x2c4] ss:$48 sps:$4 sm:$0xff]  }
  0x91   :  { %1931 = vmatpush1.bf16.msra.mxu1 %v5760_v62  ;;  %2100 = vmatprep.subr.bf16.mxu0 %v5845_v14  ;;  %v5852_v62 = vld [vmem:[#allocation2 + $0x308] ss:$48 sps:$4 sm:$0xff]  }
  0x92   :  { %1932 = vmatprep.subr.bf16.mxu1 %v5768_v0  ;;  %v5860_v0 = vld [vmem:[#allocation2 + $0x36c] ss:$48 sps:$4 sm:$0xff]   ;;  %v5876_v14 = vld [vmem:[#allocation2 + $0x488] ss:$48 sps:$4 sm:$0xff]  }
  0x93   :  { %2090 = vmatmul.mubr.bf16.vlgmr.msra.gmra.mrb[0].mxu0 %v6747_v57 }
  0x94   :  { %2101 = vmatpush1.bf16.msra.mxu0 %v5843_v17  ;;  %2132 = vmatprep.mubr.bf16.mxu0 %v6648_v63  ;;  %v5941_v17 = vld [vmem:[#allocation2 + $0x324] ss:$48 sps:$4 sm:$0xff]  }
  0x95   :  { %1933 = vmatpush1.bf16.msra.mxu1 %v5766_v3  ;;  %2102 = vmatprep.subr.bf16.mxu0 %v5851_v19  ;;  %v5858_v3 = vld [vmem:[#allocation2 + $0x368] ss:$48 sps:$4 sm:$0xff]  }
  0x96   :  { %1934 = vmatprep.subr.bf16.mxu1 %v5774_v4  ;;  %v5915_v4 = vld [vmem:[#allocation2 + $0x1a0] ss:$48 sps:$4 sm:$0xff]   ;;  %v5882_v19 = vld [vmem:[#allocation2 + $0x4e8] ss:$48 sps:$4 sm:$0xff]  }
  0x98   :  { %2103 = vmatpush1.bf16.msra.mxu0 %v5849_v22  ;;  %v5947_v22 = vld [vmem:[#allocation2 + $0x384] ss:$48 sps:$4 sm:$0xff]  }
  0x99   :  { %1935 = vmatpush1.bf16.msra.mxu1 %v5772_v7  ;;  %2104 = vmatprep.subr.bf16.mxu0 %v5857_v23  ;;  %v5872_v7 = vld [vmem:[#allocation2 + $0x42c] ss:$48 sps:$4 sm:$0xff]   ;;  %v5888_v23 = vld [vmem:[#allocation2 + $0x548] ss:$48 sps:$4 sm:$0xff]  }
  0x9a   :  { %1936 = vmatprep.subr.bf16.mxu1 %v5780_v8  ;;  %v5921_v8 = vld [vmem:[#allocation2 + $0x200] ss:$48 sps:$4 sm:$0xff]  }
  0x9c   :  { %2105 = vmatpush1.bf16.msra.mxu0 %v5855_v26  ;;  %v5953_v26 = vld [vmem:[#allocation2 + $0x3e4] ss:$48 sps:$4 sm:$0xff]  }
  0x9d   :  { %1937 = vmatpush1.bf16.msra.mxu1 %v5778_v11  ;;  %2106 = vmatprep.subr.bf16.mxu0 %v5863_v27  ;;  %v5878_v11 = vld [vmem:[#allocation2 + $0x48c] ss:$48 sps:$4 sm:$0xff]   ;;  %v5894_v27 = vld [vmem:[#allocation2 + $0x5a8] ss:$48 sps:$4 sm:$0xff]  }
  0x9e   :  { %1938 = vmatprep.subr.bf16.mxu1 %v5786_v12  ;;  %v5927_v12 = vld [vmem:[#allocation2 + $0x260] ss:$48 sps:$4 sm:$0xff]  }
  0xa0   :  { %2107 = vmatpush1.bf16.msra.mxu0 %v5861_v31  ;;  %v5959_v31 = vld [vmem:[#allocation2 + $0x444] ss:$48 sps:$4 sm:$0xff]  }
  0xa1   :  { %1939 = vmatpush1.bf16.msra.mxu1 %v5784_v15  ;;  %2108 = vmatprep.subr.bf16.mxu0 %v5869_v32  ;;  %v5884_v15 = vld [vmem:[#allocation2 + $0x4ec] ss:$48 sps:$4 sm:$0xff]   ;;  %v5900_v32 = vld [vmem:[#allocation2 + $0x608] ss:$48 sps:$4 sm:$0xff]  }
  0xa2   :  { %1940 = vmatprep.subr.bf16.mxu1 %v5792_v16  ;;  %v5933_v16 = vld [vmem:[#allocation2 + $0x2c0] ss:$48 sps:$4 sm:$0xff]  }
  0xa4   :  { %2109 = vmatpush1.bf16.msra.mxu0 %v5867_v35  ;;  %v5965_v35 = vld [vmem:[#allocation2 + $0x4a4] ss:$48 sps:$4 sm:$0xff]  }
  0xa5   :  { %1941 = vmatpush1.bf16.msra.mxu1 %v5790_v20  ;;  %2110 = vmatprep.subr.bf16.mxu0 %v5875_v36  ;;  %v5890_v20 = vld [vmem:[#allocation2 + $0x54c] ss:$48 sps:$4 sm:$0xff]   ;;  %v5906_v36 = vld [vmem:[#allocation2 + $0x668] ss:$48 sps:$4 sm:$0xff]  }
  0xa6   :  { %1942 = vmatprep.subr.bf16.mxu1 %v5798_v21  ;;  %v5939_v21 = vld [vmem:[#allocation2 + $0x320] ss:$48 sps:$4 sm:$0xff]  }
  0xa8   :  { %2111 = vmatpush1.bf16.msra.mxu0 %v5873_v39  ;;  %v5971_v39 = vld [vmem:[#allocation2 + $0x504] ss:$48 sps:$4 sm:$0xff]  }
  0xa9   :  { %1943 = vmatpush1.bf16.msra.mxu1 %v5796_v24  ;;  %2112 = vmatprep.subr.bf16.mxu0 %v5881_v40  ;;  %v5896_v24 = vld [vmem:[#allocation2 + $0x5ac] ss:$48 sps:$4 sm:$0xff]   ;;  %v5912_v40 = vld [vmem:[#allocation2 + $0x6c8] ss:$48 sps:$4 sm:$0xff]  }
  0xaa   :  { %1971 = vmatprep.subr.bf16.mxu1 %v5805_v25  ;;  %v5945_v25 = vld [vmem:[#allocation2 + $0x380] ss:$48 sps:$4 sm:$0xff]  }
  0xac   :  { %1961 = vmatmul.mubr.bf16.vlgmr.msra.gmra.mrb[0].mxu1 %v6756_v28  ;;  %2113 = vmatpush1.bf16.msra.mxu0 %v5879_v43  ;;  %v5977_v43 = vld [vmem:[#allocation2 + $0x564] ss:$48 sps:$4 sm:$0xff]  }
  0xad   :  { %1972 = vmatpush1.bf16.msra.mxu1 %v5803_v29  ;;  %2003 = vmatprep.mubr.bf16.mxu1 %v6740_v18  ;;  %v5902_v29 = vld [vmem:[#allocation2 + $0x60c] ss:$48 sps:$4 sm:$0xff]  }
  0xae   :  { %1973 = vmatprep.subr.bf16.mxu1 %v5811_v30  ;;  %2114 = vmatprep.subr.bf16.mxu0 %v5887_v44  ;;  %v5951_v30 = vld [vmem:[#allocation2 + $0x3e0] ss:$48 sps:$4 sm:$0xff]   ;;  %v5918_v44 = vld [vmem:[#allocation2 + $0x728] ss:$48 sps:$4 sm:$0xff]  }
  0xb0   :  { %2115 = vmatpush1.bf16.msra.mxu0 %v5885_v47  ;;  %v5983_v47 = vld [vmem:[#allocation2 + $0x5c4] ss:$48 sps:$4 sm:$0xff]  }
  0xb1   :  { %1974 = vmatpush1.bf16.msra.mxu1 %v5809_v33  ;;  %2229 = vmatprep.subr.bf16.mxu0 %v5893_v48  ;;  %v5908_v33 = vld [vmem:[#allocation2 + $0x66c] ss:$48 sps:$4 sm:$0xff]   ;;  %v5924_v48 = vld [vmem:[#allocation2 + $0x788] ss:$48 sps:$4 sm:$0xff]  }
  0xb2   :  { %1975 = vmatprep.subr.bf16.mxu1 %v5817_v34  ;;  %v5957_v34 = vld [vmem:[#allocation2 + $0x440] ss:$48 sps:$4 sm:$0xff]  }
  0xb3   :  { %2133 = vmatmul.mubr.bf16.vlgmr.msra.gmra.mrb[0].mxu0 %v6756_v28 }
  0xb4   :  { %2230 = vmatpush1.bf16.msra.mxu0 %v5891_v51  ;;  %2261 = vmatprep.mubr.bf16.mxu0 %v6740_v18  ;;  %v5866_v18 = vld [vmem:[#allocation2 + $0x3cc] ss:$48 sps:$4 sm:$0xff]   ;;  %v5989_v51 = vld [vmem:[#allocation2 + $0x624] ss:$48 sps:$4 sm:$0xff]  }
  0xb5   :  { %1976 = vmatpush1.bf16.msra.mxu1 %v5815_v37  ;;  %2231 = vmatprep.subr.bf16.mxu0 %v5899_v52  ;;  %v5914_v37 = vld [vmem:[#allocation2 + $0x6cc] ss:$48 sps:$4 sm:$0xff]   ;;  %v5930_v52 = vld [vmem:[#allocation2 + $0x7e8] ss:$48 sps:$4 sm:$0xff]  }
  0xb6   :  { %1977 = vmatprep.subr.bf16.mxu1 %v5823_v38  ;;  %v5963_v38 = vld [vmem:[#allocation2 + $0x4a0] ss:$48 sps:$4 sm:$0xff]  }
  0xb8   :  { %2232 = vmatpush1.bf16.msra.mxu0 %v5897_v55  ;;  %v5995_v55 = vld [vmem:[#allocation2 + $0x684] ss:$48 sps:$4 sm:$0xff]  }
  0xb9   :  { %1978 = vmatpush1.bf16.msra.mxu1 %v5821_v41  ;;  %2233 = vmatprep.subr.bf16.mxu0 %v5905_v56  ;;  %v5920_v41 = vld [vmem:[#allocation2 + $0x72c] ss:$48 sps:$4 sm:$0xff]   ;;  %v5936_v56 = vld [vmem:[#allocation2 + $0x848] ss:$48 sps:$4 sm:$0xff]  }
  0xba   :  { %1979 = vmatprep.subr.bf16.mxu1 %v5829_v42  ;;  %v5969_v42 = vld [vmem:[#allocation2 + $0x500] ss:$48 sps:$4 sm:$0xff]  }
  0xbc   :  { %2234 = vmatpush1.bf16.msra.mxu0 %v5903_v60  ;;  %v6001_v60 = vld [vmem:[#allocation2 + $0x6e4] ss:$48 sps:$4 sm:$0xff]  }
  0xbd   :  { %1980 = vmatpush1.bf16.msra.mxu1 %v5827_v45  ;;  %2235 = vmatprep.subr.bf16.mxu0 %v5911_v61  ;;  %v5926_v45 = vld [vmem:[#allocation2 + $0x78c] ss:$48 sps:$4 sm:$0xff]   ;;  %v5942_v61 = vld [vmem:[#allocation2 + $0x8a8] ss:$48 sps:$4 sm:$0xff]  }
  0xbe   :  { %1981 = vmatprep.subr.bf16.mxu1 %v5835_v46  ;;  %v5975_v46 = vld [vmem:[#allocation2 + $0x560] ss:$48 sps:$4 sm:$0xff]  }
  0xc0   :  { %2236 = vmatpush1.bf16.msra.mxu0 %v5909_v1  ;;  %v6007_v1 = vld [vmem:[#allocation2 + $0x744] ss:$48 sps:$4 sm:$0xff]  }
  0xc1   :  { %1982 = vmatpush1.bf16.msra.mxu1 %v5833_v49  ;;  %2237 = vmatprep.subr.bf16.mxu0 %v5917_v2  ;;  %v5932_v49 = vld [vmem:[#allocation2 + $0x7ec] ss:$48 sps:$4 sm:$0xff]   ;;  %v5948_v2 = vld [vmem:[#allocation2 + $0x18] ss:$48 sps:$4 sm:$0xff]  }
  0xc2   :  { %1983 = vmatprep.subr.bf16.mxu1 %v5841_v50  ;;  %v5981_v50 = vld [vmem:[#allocation2 + $0x5c0] ss:$48 sps:$4 sm:$0xff]  }
  0xc4   :  { %2238 = vmatpush1.bf16.msra.mxu0 %v5915_v4  ;;  %v5954_v4 = vld [vmem:[#allocation2 + $0x78] ss:$48 sps:$4 sm:$0xff]  }
  0xc5   :  { %1984 = vmatpush1.bf16.msra.mxu1 %v5839_v53  ;;  %2239 = vmatprep.subr.bf16.mxu0 %v5923_v5  ;;  %v5938_v53 = vld [vmem:[#allocation2 + $0x84c] ss:$48 sps:$4 sm:$0xff]  }
  0xc6   :  { %1985 = vmatprep.subr.bf16.mxu1 %v5848_v54  ;;  %v5987_v54 = vld [vmem:[#allocation2 + $0x620] ss:$48 sps:$4 sm:$0xff]   ;;  %v5962_v5 = vld [vmem:[#allocation2 + $0xdc] ss:$48 sps:$4 sm:$0xff]  }
  0xc8   :  { %2240 = vmatpush1.bf16.msra.mxu0 %v5921_v8  ;;  %v5960_v8 = vld [vmem:[#allocation2 + $0xd8] ss:$48 sps:$4 sm:$0xff]  }
  0xc9   :  { %1986 = vmatpush1.bf16.msra.mxu1 %v5846_v58  ;;  %2241 = vmatprep.subr.bf16.mxu0 %v5929_v9  ;;  %v5944_v58 = vld [vmem:[#allocation2 + $0x8ac] ss:$48 sps:$4 sm:$0xff]   ;;  %v6019_v9 = vld [vmem:[#allocation2 + $0x804] ss:$48 sps:$4 sm:$0xff]  }
  0xca   :  { %1987 = vmatprep.subr.bf16.mxu1 %v5854_v59  ;;  %v5993_v59 = vld [vmem:[#allocation2 + $0x680] ss:$48 sps:$4 sm:$0xff]  }
  0xcc   :  { %2242 = vmatpush1.bf16.msra.mxu0 %v5927_v12  ;;  %v6025_v12 = vld [vmem:[#allocation2 + $0x864] ss:$48 sps:$4 sm:$0xff]  }
  0xcd   :  { %1988 = vmatpush1.bf16.msra.mxu1 %v5852_v62  ;;  %2243 = vmatprep.subr.bf16.mxu0 %v5935_v13  ;;  %v5950_v62 = vld [vmem:[#allocation2 + $0x1c] ss:$48 sps:$4 sm:$0xff]   ;;  %v5966_v13 = vld [vmem:[#allocation2 + $0x138] ss:$48 sps:$4 sm:$0xff]  }
  0xce   :  { %1989 = vmatprep.subr.bf16.mxu1 %v5860_v0  ;;  %v5999_v0 = vld [vmem:[#allocation2 + $0x6e0] ss:$48 sps:$4 sm:$0xff]  }
  0xd0   :  { %2244 = vmatpush1.bf16.msra.mxu0 %v5933_v16  ;;  %v6031_v16 = vld [vmem:[#allocation2 + $0x8c4] ss:$48 sps:$4 sm:$0xff]  }
  0xd1   :  { %1990 = vmatpush1.bf16.msra.mxu1 %v5858_v3  ;;  %2245 = vmatprep.subr.bf16.mxu0 %v5941_v17  ;;  %v5956_v3 = vld [vmem:[#allocation2 + $0x7c] ss:$48 sps:$4 sm:$0xff]   ;;  %v5972_v17 = vld [vmem:[#allocation2 + $0x198] ss:$48 sps:$4 sm:$0xff]  }
  0xd2   :  { %1991 = vmatprep.subr.bf16.mxu1 %v5866_v18  ;;  %v6013_v18 = vld [vmem:[#allocation2 + $0x7a4] ss:$48 sps:$4 sm:$0xff]  }
  0xd4   :  { %2246 = vmatpush1.bf16.msra.mxu0 %v5939_v21  ;;  %v6040_v21 = vld [vmem:[#allocation7 + $0x4] ss:$12 sps:$4 sm:$0xff]  }
  0xd5   :  { %1992 = vmatpush1.bf16.msra.mxu1 %v5864_v6  ;;  %2247 = vmatprep.subr.bf16.mxu0 %v5947_v22  ;;  %v6770_v6 = vld [vmem:[%s6882_s0 + $0x4] ss:$12 sps:$4 sm:$0xff]  }
  0xd6   :  { %1993 = vmatprep.subr.bf16.mxu1 %v5872_v7  ;;  %v6011_v7 = vld [vmem:[#allocation2 + $0x7a0] ss:$48 sps:$4 sm:$0xff]   ;;  %v5978_v22 = vld [vmem:[#allocation2 + $0x1f8] ss:$48 sps:$4 sm:$0xff]  }
  0xd8   :  { %2248 = vmatpush1.bf16.msra.mxu0 %v5945_v25  ;;  %v6046_v25 = vld [vmem:[#allocation7 + $0x1c] ss:$12 sps:$4 sm:$0xff]  }
  0xd9   :  { %1994 = vmatpush1.bf16.msra.mxu1 %v5870_v10  ;;  %2249 = vmatprep.subr.bf16.mxu0 %v5953_v26  ;;  %v5968_v10 = vld [vmem:[#allocation2 + $0x13c] ss:$48 sps:$4 sm:$0xff]   ;;  %v5984_v26 = vld [vmem:[#allocation2 + $0x258] ss:$48 sps:$4 sm:$0xff]  }
  0xda   :  { %1995 = vmatprep.subr.bf16.mxu1 %v5878_v11  ;;  %v6017_v11 = vld [vmem:[#allocation2 + $0x800] ss:$48 sps:$4 sm:$0xff]  }
  0xdc   :  { %2250 = vmatpush1.bf16.msra.mxu0 %v5951_v30  ;;  %v6052_v30 = vld [vmem:[#allocation7 + $0x34] ss:$12 sps:$4 sm:$0xff]  }
  0xdd   :  { %1996 = vmatpush1.bf16.msra.mxu1 %v5876_v14  ;;  %2251 = vmatprep.subr.bf16.mxu0 %v5959_v31  ;;  %v5974_v14 = vld [vmem:[#allocation2 + $0x19c] ss:$48 sps:$4 sm:$0xff]   ;;  %v5990_v31 = vld [vmem:[#allocation2 + $0x2b8] ss:$48 sps:$4 sm:$0xff]  }
  0xde   :  { %1997 = vmatprep.subr.bf16.mxu1 %v5884_v15  ;;  %v6023_v15 = vld [vmem:[#allocation2 + $0x860] ss:$48 sps:$4 sm:$0xff]  }
  0xe0   :  { %2252 = vmatpush1.bf16.msra.mxu0 %v5957_v34  ;;  %v6058_v34 = vld [vmem:[#allocation7 + $0x4c] ss:$12 sps:$4 sm:$0xff]  }
  0xe1   :  { %1998 = vmatpush1.bf16.msra.mxu1 %v5882_v19  ;;  %2253 = vmatprep.subr.bf16.mxu0 %v5965_v35  ;;  %v5980_v19 = vld [vmem:[#allocation2 + $0x1fc] ss:$48 sps:$4 sm:$0xff]   ;;  %v5996_v35 = vld [vmem:[#allocation2 + $0x318] ss:$48 sps:$4 sm:$0xff]  }
  0xe2   :  { %1999 = vmatprep.subr.bf16.mxu1 %v5890_v20  ;;  %v6029_v20 = vld [vmem:[#allocation2 + $0x8c0] ss:$48 sps:$4 sm:$0xff]  }
  0xe4   :  { %2254 = vmatpush1.bf16.msra.mxu0 %v5963_v38  ;;  %v6002_v38 = vld [vmem:[#allocation2 + $0x378] ss:$48 sps:$4 sm:$0xff]  }
  0xe5   :  { %2000 = vmatpush1.bf16.msra.mxu1 %v5888_v23  ;;  %2255 = vmatprep.subr.bf16.mxu0 %v5971_v39  ;;  %v5986_v23 = vld [vmem:[#allocation2 + $0x25c] ss:$48 sps:$4 sm:$0xff]  }
  0xe6   :  { %2001 = vmatprep.subr.bf16.mxu1 %v5896_v24  ;;  %v6038_v24 = vld [vmem:[#allocation7] ss:$12 sps:$4 sm:$0xff]  }
  0xe7   :  { %v6010_v39 = vld [vmem:[#allocation2 + $0x3dc] ss:$48 sps:$4 sm:$0xff]  }
  0xe8   :  { %2256 = vmatpush1.bf16.msra.mxu0 %v5969_v42  ;;  %v6008_v42 = vld [vmem:[#allocation2 + $0x3d8] ss:$48 sps:$4 sm:$0xff]  }
  0xe9   :  { %2002 = vmatpush1.bf16.msra.mxu1 %v5894_v27  ;;  %2257 = vmatprep.subr.bf16.mxu0 %v5977_v43  ;;  %v5992_v27 = vld [vmem:[#allocation2 + $0x2bc] ss:$48 sps:$4 sm:$0xff]  }
  0xea   :  { %2014 = vmatprep.subr.bf16.mxu1 %v5902_v29  ;;  %v6044_v29 = vld [vmem:[#allocation7 + $0x18] ss:$12 sps:$4 sm:$0xff]   ;;  %v6016_v43 = vld [vmem:[#allocation2 + $0x43c] ss:$48 sps:$4 sm:$0xff]  }
  0xec   :  { %2004 = vmatmul.mubr.bf16.vlgmr.msra.gmra.mrb[4].mxu1 %v6747_v57  ;;  %2258 = vmatpush1.bf16.msra.mxu0 %v5975_v46  ;;  %v6014_v46 = vld [vmem:[#allocation2 + $0x438] ss:$48 sps:$4 sm:$0xff]  }
  0xed   :  { %2015 = vmatpush1.bf16.msra.mxu1 %v5900_v32  ;;  %2046 = vmatprep.mubr.bf16.mxu1 %v6648_v63  ;;  %v5998_v32 = vld [vmem:[#allocation2 + $0x31c] ss:$48 sps:$4 sm:$0xff]  }
  0xee   :  { %2016 = vmatprep.subr.bf16.mxu1 %v5908_v33  ;;  %2259 = vmatprep.subr.bf16.mxu0 %v5983_v47  ;;  %v6050_v33 = vld [vmem:[#allocation7 + $0x30] ss:$12 sps:$4 sm:$0xff]  }
  0xef   :  { %v6022_v47 = vld [vmem:[#allocation2 + $0x49c] ss:$48 sps:$4 sm:$0xff]  }
  0xf0   :  { %2260 = vmatpush1.bf16.msra.mxu0 %v5981_v50  ;;  %v6020_v50 = vld [vmem:[#allocation2 + $0x498] ss:$48 sps:$4 sm:$0xff]  }
  0xf1   :  { %2017 = vmatpush1.bf16.msra.mxu1 %v5906_v36  ;;  %2272 = vmatprep.subr.bf16.mxu0 %v5989_v51  ;;  %v6004_v36 = vld [vmem:[#allocation2 + $0x37c] ss:$48 sps:$4 sm:$0xff]  }
  0xf2   :  { %2018 = vmatprep.subr.bf16.mxu1 %v5914_v37  ;;  %v6056_v37 = vld [vmem:[#allocation7 + $0x48] ss:$12 sps:$4 sm:$0xff]   ;;  %v6028_v51 = vld [vmem:[#allocation2 + $0x4fc] ss:$48 sps:$4 sm:$0xff]  }
  0xf3   :  { %2262 = vmatmul.mubr.bf16.vlgmr.msra.gmra.mrb[4].mxu0 %v6747_v57  ;;  %v6005_v57 = vld [vmem:[#allocation2 + $0x740] ss:$48 sps:$4 sm:$0xff]  }
  0xf4   :  { %2273 = vmatpush1.bf16.msra.mxu0 %v5987_v54  ;;  %2304 = vmatprep.mubr.bf16.mxu0 %v6648_v63  ;;  %v6026_v54 = vld [vmem:[#allocation2 + $0x4f8] ss:$48 sps:$4 sm:$0xff]  }
  0xf5   :  { %2019 = vmatpush1.bf16.msra.mxu1 %v5912_v40  ;;  %2274 = vmatprep.subr.bf16.mxu0 %v5995_v55  ;;  %v6062_v40 = vld [vmem:[#allocation7 + $0x60] ss:$12 sps:$4 sm:$0xff]  }
  0xf6   :  { %2020 = vmatprep.subr.bf16.mxu1 %v5920_v41  ;;  %v6070_v41 = vld [vmem:[#allocation7 + $0x7c] ss:$12 sps:$4 sm:$0xff]   ;;  %v6034_v55 = vld [vmem:[#allocation2 + $0x55c] ss:$48 sps:$4 sm:$0xff]  }
  0xf8   :  { %2275 = vmatpush1.bf16.msra.mxu0 %v5993_v59  ;;  %v6032_v59 = vld [vmem:[#allocation2 + $0x558] ss:$48 sps:$4 sm:$0xff]  }
  0xf9   :  { %2021 = vmatpush1.bf16.msra.mxu1 %v5918_v44  ;;  %2276 = vmatprep.subr.bf16.mxu0 %v6001_v60  ;;  %v6068_v44 = vld [vmem:[#allocation7 + $0x78] ss:$12 sps:$4 sm:$0xff]   ;;  %v6037_v60 = vld [vmem:[#allocation2 + $0x5bc] ss:$48 sps:$4 sm:$0xff]  }
  0xfa   :  { %2022 = vmatprep.subr.bf16.mxu1 %v5926_v45  ;;  %v6076_v45 = vld [vmem:[#allocation7 + $0x94] ss:$12 sps:$4 sm:$0xff]  }
  0xfc   :  { %2277 = vmatpush1.bf16.msra.mxu0 %v5999_v0  ;;  %v6035_v0 = vld [vmem:[#allocation2 + $0x5b8] ss:$48 sps:$4 sm:$0xff]  }
  0xfd   :  { %2023 = vmatpush1.bf16.msra.mxu1 %v5924_v48  ;;  %2278 = vmatprep.subr.bf16.mxu0 %v6007_v1  ;;  %v6074_v48 = vld [vmem:[#allocation7 + $0x90] ss:$12 sps:$4 sm:$0xff]  }
  0xfe   :  { %2024 = vmatprep.subr.bf16.mxu1 %v5932_v49  ;;  %v6082_v49 = vld [vmem:[#allocation7 + $0xac] ss:$12 sps:$4 sm:$0xff]   ;;  %v6043_v1 = vld [vmem:[#allocation2 + $0x61c] ss:$48 sps:$4 sm:$0xff]  }
 0x100   :  { %2279 = vmatpush1.bf16.msra.mxu0 %v6005_v57  ;;  %v6106_v57 = vld [vmem:[#allocation7 + $0x10c] ss:$12 sps:$4 sm:$0xff]  }
 0x101   :  { %2025 = vmatpush1.bf16.msra.mxu1 %v5930_v52  ;;  %2280 = vmatprep.subr.bf16.mxu0 %v6013_v18  ;;  %v6080_v52 = vld [vmem:[#allocation7 + $0xa8] ss:$12 sps:$4 sm:$0xff]   ;;  %v6049_v18 = vld [vmem:[#allocation2 + $0x67c] ss:$48 sps:$4 sm:$0xff]  }
 0x102   :  { %2026 = vmatprep.subr.bf16.mxu1 %v5938_v53  ;;  %v6088_v53 = vld [vmem:[#allocation7 + $0xc4] ss:$12 sps:$4 sm:$0xff]  }
 0x104   :  { %2281 = vmatpush1.bf16.msra.mxu0 %v6011_v7  ;;  %v6777_v7 = vld [vmem:[%s6882_s0] ss:$12 sps:$4 sm:$0xff]  }
 0x105   :  { %2027 = vmatpush1.bf16.msra.mxu1 %v5936_v56  ;;  %2282 = vmatprep.subr.bf16.mxu0 %v6019_v9  ;;  %v6086_v56 = vld [vmem:[#allocation7 + $0xc0] ss:$12 sps:$4 sm:$0xff]  }
 0x106   :  { %2028 = vmatprep.subr.bf16.mxu1 %v5944_v58  ;;  %v6094_v58 = vld [vmem:[#allocation7 + $0xdc] ss:$12 sps:$4 sm:$0xff]   ;;  %v6055_v9 = vld [vmem:[#allocation2 + $0x6dc] ss:$48 sps:$4 sm:$0xff]  }
 0x108   :  { %2283 = vmatpush1.bf16.msra.mxu0 %v6017_v11  ;;  %v6118_v11 = vld [vmem:[#allocation7 + $0x13c] ss:$12 sps:$4 sm:$0xff]  }
 0x109   :  { %2029 = vmatpush1.bf16.msra.mxu1 %v5942_v61  ;;  %2284 = vmatprep.subr.bf16.mxu0 %v6025_v12  ;;  %v6092_v61 = vld [vmem:[#allocation7 + $0xd8] ss:$12 sps:$4 sm:$0xff]   ;;  %v6053_v12 = vld [vmem:[#allocation2 + $0x6d8] ss:$48 sps:$4 sm:$0xff]  }
 0x10a   :  { %2143 = vmatprep.subr.bf16.mxu1 %v5950_v62  ;;  %v6100_v62 = vld [vmem:[#allocation7 + $0xf4] ss:$12 sps:$4 sm:$0xff]  }
 0x10c   :  { %2047 = vmatmul.mubr.bf16.vlgmr.msra.gmra.mrb[4].mxu1 %v6756_v28  ;;  %2285 = vmatpush1.bf16.msra.mxu0 %v6023_v15  ;;  %v6124_v15 = vld [vmem:[#allocation7 + $0x154] ss:$12 sps:$4 sm:$0xff]  }
 0x10d   :  { %2144 = vmatpush1.bf16.msra.mxu1 %v5948_v2  ;;  %2175 = vmatprep.mubr.bf16.mxu1 %v6770_v6  ;;  %v6098_v2 = vld [vmem:[#allocation7 + $0xf0] ss:$12 sps:$4 sm:$0xff]  }
 0x10e   :  { %2145 = vmatprep.subr.bf16.mxu1 %v5956_v3  ;;  %2286 = vmatprep.subr.bf16.mxu0 %v6031_v16  ;;  %v6041_v3 = vld [vmem:[#allocation2 + $0x618] ss:$48 sps:$4 sm:$0xff]  }
 0x10f   :  { %v6059_v16 = vld [vmem:[#allocation2 + $0x738] ss:$48 sps:$4 sm:$0xff]  }
 0x110   :  { %2287 = vmatpush1.bf16.msra.mxu0 %v6029_v20  ;;  %v6130_v20 = vld [vmem:[#allocation7 + $0x16c] ss:$12 sps:$4 sm:$0xff]  }
 0x111   :  { %2146 = vmatpush1.bf16.msra.mxu1 %v5954_v4  ;;  %4374 = vmatprep.subr.bf16.mxu0 %v6040_v21  ;;  %v6104_v4 = vld [vmem:[#allocation7 + $0x108] ss:$12 sps:$4 sm:$0xff]   ;;  %v6065_v21 = vld [vmem:[#allocation2 + $0x798] ss:$48 sps:$4 sm:$0xff]  }
 0x112   :  { %2147 = vmatprep.subr.bf16.mxu1 %v5962_v5  ;;  %v6112_v5 = vld [vmem:[#allocation7 + $0x124] ss:$12 sps:$4 sm:$0xff]  }
 0x113   :  { %2305 = vmatmul.mubr.bf16.vlgmr.msra.gmra.mrb[4].mxu0 %v6756_v28  ;;  %v6064_v28 = vld [vmem:[#allocation7 + $0x64] ss:$12 sps:$4 sm:$0xff]  }
 0x114   :  { %4375 = vmatpush1.bf16.msra.mxu0 %v6038_v24  ;;  %v6160_v24 = vld [vmem:[#allocation7 + $0x184] ss:$12 sps:$4 sm:$0xff]  }
 0x115   :  { %2148 = vmatpush1.bf16.msra.mxu1 %v5960_v8  ;;  %4376 = vmatprep.subr.bf16.mxu0 %v6046_v25  ;;  %v6047_v8 = vld [vmem:[#allocation2 + $0x678] ss:$48 sps:$4 sm:$0xff]  }
 0x116   :  { %2149 = vmatprep.subr.bf16.mxu1 %v5968_v10  ;;  %v6110_v10 = vld [vmem:[#allocation7 + $0x120] ss:$12 sps:$4 sm:$0xff]  }
 0x117   :  { %v6071_v25 = vld [vmem:[#allocation2 + $0x7f8] ss:$48 sps:$4 sm:$0xff]  }
 0x118   :  { %4377 = vmatpush1.bf16.msra.mxu0 %v6044_v29  ;;  %v6085_v29 = vld [vmem:[#allocation2 + $0x8bc] ss:$48 sps:$4 sm:$0xff]  }
 0x119   :  { %2150 = vmatpush1.bf16.msra.mxu1 %v5966_v13  ;;  %4378 = vmatprep.subr.bf16.mxu0 %v6052_v30  ;;  %v6061_v13 = vld [vmem:[#allocation2 + $0x73c] ss:$48 sps:$4 sm:$0xff]   ;;  %v6083_v30 = vld [vmem:[#allocation2 + $0x8b8] ss:$48 sps:$4 sm:$0xff]  }
 0x11a   :  { %2151 = vmatprep.subr.bf16.mxu1 %v5974_v14  ;;  %v6116_v14 = vld [vmem:[#allocation7 + $0x138] ss:$12 sps:$4 sm:$0xff]  }
 0x11c   :  { %4379 = vmatpush1.bf16.msra.mxu0 %v6050_v33  ;;  %v6097_v33 = vld [vmem:[#allocation2 + $0x8c] ss:$48 sps:$4 sm:$0xff]  }
 0x11d   :  { %2152 = vmatpush1.bf16.msra.mxu1 %v5972_v17  ;;  %4380 = vmatprep.subr.bf16.mxu0 %v6058_v34  ;;  %v6067_v17 = vld [vmem:[#allocation2 + $0x79c] ss:$48 sps:$4 sm:$0xff]  }
 0x11e   :  { %2153 = vmatprep.subr.bf16.mxu1 %v5980_v19  ;;  %v6122_v19 = vld [vmem:[#allocation7 + $0x150] ss:$12 sps:$4 sm:$0xff]  }
 0x11f   :  { %v6784_v34 = vld [vmem:[%s6882_s0 + $0x8] ss:$12 sps:$4 sm:$0xff]   ;;  %s6649_s0 = smov [#allocation10]  }
 0x120   :  { %4381 = vmatpush1.bf16.msra.mxu0 %v6056_v37  ;;  %v6101_v37 = vld [vmem:[#allocation2 + $0xe8] ss:$48 sps:$4 sm:$0xff]   ;;  %s4889_s1 = sshll.u32 %s6649_s0, 4  ;;  %s4890_s1 = int_to_ptr.vmem [resolvable:$true] %s4889_s1 }
 0x121   :  { %2154 = vmatpush1.bf16.msra.mxu1 %v5978_v22  ;;  %4382 = vmatprep.subr.bf16.mxu0 %v6064_v28  ;;  %v6073_v22 = vld [vmem:[#allocation2 + $0x7fc] ss:$48 sps:$4 sm:$0xff]   ;;  %v369_v28 = vlaneseq  ;;  %s6610_s21 = scalar_lea.vmem %s4890_s1, 768  ;;  %p6615_p5 = scmp.lt.s32.totalorder %s4890_s1, %s4890_s1 }
 0x122   :  { %2155 = vmatprep.subr.bf16.mxu1 %v5986_v23  ;;  %v6128_v23 = vld [vmem:[#allocation7 + $0x168] ss:$12 sps:$4 sm:$0xff]   ;;  %p6611_p4 = scmp.ne.s32.totalorder %s4890_s1, %s6610_s21  ;;  %p6616_p6 = scmp.lt.s32.totalorder %s6610_s21, %s6610_s21 }
 0x124   :  { %4383 = vmatpush1.bf16.msra.mxu0 %v6062_v40  ;;  %v6788_v40 = vshrl.u32 %v369_v28, 7  ;;  %v6146_v28 = vld [vmem:[#allocation2 + $0x4a8] ss:$48 sps:$4 sm:$0xff]   ;;  %p6617_p7 = por %p6616_p6, %p6615_p5 }
 0x125   :  { %2156 = vmatpush1.bf16.msra.mxu1 %v5984_v26  ;;  %4384 = vmatprep.subr.bf16.mxu0 %v6070_v41  ;;  %v6079_v26 = vld [vmem:[#allocation2 + $0x85c] ss:$48 sps:$4 sm:$0xff]  }
 0x126   :  { %2157 = vmatprep.subr.bf16.mxu1 %v5992_v27  ;;  %v6077_v27 = vld [vmem:[#allocation2 + $0x858] ss:$48 sps:$4 sm:$0xff]   ;;  %v6115_v41 = vld [vmem:[#allocation2 + $0x1ac] ss:$48 sps:$4 sm:$0xff]   ;;  %p6618_p8 = pnand %p6617_p7, %p6611_p4 }
 0x128   :  { %4385 = vmatpush1.bf16.msra.mxu0 %v6068_v44  ;;  %v6793_v44 = vsub.s32 0, %v6788_v40 }
 0x129   :  { %2158 = vmatpush1.bf16.msra.mxu1 %v5990_v31  ;;  %4386 = vmatprep.subr.bf16.mxu0 %v6076_v45  ;;  %v6091_v31 = vld [vmem:[#allocation2 + $0x2c] ss:$48 sps:$4 sm:$0xff]  }
 0x12a   :  { %2159 = vmatprep.subr.bf16.mxu1 %v5998_v32  ;;  %v6089_v32 = vld [vmem:[#allocation2 + $0x28] ss:$48 sps:$4 sm:$0xff]   ;;  %v6121_v45 = vld [vmem:[#allocation2 + $0x20c] ss:$48 sps:$4 sm:$0xff]  }
 0x12c   :  { %4387 = vmatpush1.bf16.msra.mxu0 %v6074_v48  ;;  %v6127_v48 = vld [vmem:[#allocation2 + $0x26c] ss:$48 sps:$4 sm:$0xff]  }
 0x12d   :  { %2160 = vmatpush1.bf16.msra.mxu1 %v5996_v35  ;;  %4388 = vmatprep.subr.bf16.mxu0 %v6082_v49  ;;  %v6095_v35 = vld [vmem:[#allocation2 + $0x88] ss:$48 sps:$4 sm:$0xff]  }
 0x12e   :  { %2161 = vmatprep.subr.bf16.mxu1 %v6004_v36  ;;  %v6103_v36 = vld [vmem:[#allocation2 + $0xec] ss:$48 sps:$4 sm:$0xff]  }
 0x130   :  { %4389 = vmatpush1.bf16.msra.mxu0 %v6080_v52 }
 0x131   :  { %2162 = vmatpush1.bf16.msra.mxu1 %v6002_v38  ;;  %4390 = vmatprep.subr.bf16.mxu0 %v6088_v53  ;;  %v6109_v38 = vld [vmem:[#allocation2 + $0x14c] ss:$48 sps:$4 sm:$0xff]   ;;  %v6125_v53 = vld [vmem:[#allocation2 + $0x268] ss:$48 sps:$4 sm:$0xff]  }
 0x132   :  { %2163 = vmatprep.subr.bf16.mxu1 %v6010_v39  ;;  %v6107_v39 = vld [vmem:[#allocation2 + $0x148] ss:$48 sps:$4 sm:$0xff]  }
 0x134   :  { %4391 = vmatpush1.bf16.msra.mxu0 %v6086_v56 }
 0x135   :  { %2164 = vmatpush1.bf16.msra.mxu1 %v6008_v42  ;;  %4392 = vmatprep.subr.bf16.mxu0 %v6094_v58  ;;  %v6113_v42 = vld [vmem:[#allocation2 + $0x1a8] ss:$48 sps:$4 sm:$0xff]  }
 0x136   :  { %2165 = vmatprep.subr.bf16.mxu1 %v6016_v43  ;;  %v6790_v43 = vld [vmem:[#allocation5] sm:$0xff] }
 0x138   :  { %4393 = vmatpush1.bf16.msra.mxu0 %v6092_v61  ;;  %v6131_v61 = vld [vmem:[#allocation2 + $0x2c8] ss:$48 sps:$4 sm:$0xff]  }
 0x139   :  { %2166 = vmatpush1.bf16.msra.mxu1 %v6014_v46  ;;  %4394 = vmatprep.subr.bf16.mxu0 %v6100_v62  ;;  %v6119_v46 = vld [vmem:[#allocation2 + $0x208] ss:$48 sps:$4 sm:$0xff]  }
 0x13a   :  { %2167 = vmatprep.subr.bf16.mxu1 %v6022_v47  ;;  %v372_v47 = vrot.slane %v6790_v43, %v6793_v44 }
 0x13c   :  { %4395 = vmatpush1.bf16.msra.mxu0 %v6098_v2  ;;  %v6136_v2 = vld [vmem:[#allocation2 + $0x32c] ss:$48 sps:$4 sm:$0xff]  }
 0x13d   :  { %2168 = vmatpush1.bf16.msra.mxu1 %v6020_v50  ;;  %4396 = vmatprep.subr.bf16.mxu0 %v6106_v57 }
 0x13e   :  { %2169 = vmatprep.subr.bf16.mxu1 %v6028_v51 }
 0x140   :  { %4397 = vmatpush1.bf16.msra.mxu0 %v6104_v4  ;;  %v6134_v4 = vld [vmem:[#allocation2 + $0x328] ss:$48 sps:$4 sm:$0xff]  }
 0x141   :  { %2170 = vmatpush1.bf16.msra.mxu1 %v6026_v54  ;;  %4398 = vmatprep.subr.bf16.mxu0 %v6112_v5  ;;  %v6133_v54 = vld [vmem:[#allocation2 + $0x2cc] ss:$48 sps:$4 sm:$0xff]  }
 0x142   :  { %2171 = vmatprep.subr.bf16.mxu1 %v6034_v55  ;;  %v6158_v5 = vld [vmem:[#allocation7 + $0x180] ss:$12 sps:$4 sm:$0xff]  }
 0x144   :  { %4399 = vmatpush1.bf16.msra.mxu0 %v6110_v10  ;;  %v6137_v10 = vld [vmem:[#allocation2 + $0x388] ss:$48 sps:$4 sm:$0xff]  }
 0x145   :  { %2172 = vmatpush1.bf16.msra.mxu1 %v6032_v59  ;;  %4400 = vmatprep.subr.bf16.mxu0 %v6118_v11  ;;  %v6164_v11 = vld [vmem:[#allocation7 + $0x198] ss:$12 sps:$4 sm:$0xff]  }
 0x146   :  { %2173 = vmatprep.subr.bf16.mxu1 %v6037_v60 }
 0x148   :  { %4401 = vmatpush1.bf16.msra.mxu0 %v6116_v14  ;;  %v387_v14 = vsub.s32 4, %v6788_v40 }
 0x149   :  { %2174 = vmatpush1.bf16.msra.mxu1 %v6035_v0  ;;  %4402 = vmatprep.subr.bf16.mxu0 %v6124_v15  ;;  %v391_v15 = vsub.s32 5, %v6788_v40 }
 0x14a   :  { %2186 = vmatprep.subr.bf16.mxu1 %v6043_v1 }
 0x14c   :  { %2176 = vmatmul.mubr.bf16.vlgmr.msra.gmra.mrb[8].mxu1 %v6777_v7  ;;  %4403 = vmatpush1.bf16.msra.mxu0 %v6122_v19  ;;  %v6145_v19 = vld [vmem:[#allocation2 + $0x44c] ss:$48 sps:$4 sm:$0xff]  }
 0x14d   :  { %2187 = vmatpush1.bf16.msra.mxu1 %v6041_v3  ;;  %2218 = vmatprep.mubr.bf16.mxu1 %v6648_v63 }
 0x14e   :  { %2188 = vmatprep.subr.bf16.mxu1 %v6049_v18  ;;  %4404 = vmatprep.subr.bf16.mxu0 %v6130_v20  ;;  %v6178_v20 = vld [vmem:[#allocation7 + $0x1cc] ss:$12 sps:$4 sm:$0xff]  }
 0x150   :  { %4405 = vmatpush1.bf16.msra.mxu0 %v6128_v23  ;;  %v6143_v23 = vld [vmem:[#allocation2 + $0x448] ss:$48 sps:$4 sm:$0xff]  }
 0x151   :  { %2189 = vmatpush1.bf16.msra.mxu1 %v6047_v8  ;;  %4417 = vmatprep.subr.bf16.mxu0 %v6160_v24  ;;  %v6139_v8 = vld [vmem:[#allocation2 + $0x38c] ss:$48 sps:$4 sm:$0xff]   ;;  %v6176_v24 = vld [vmem:[#allocation7 + $0x1c8] ss:$12 sps:$4 sm:$0xff]  }
 0x152   :  { %2190 = vmatprep.subr.bf16.mxu1 %v6055_v9  ;;  %v6166_v9 = vld [vmem:[#allocation7 + $0x19c] ss:$12 sps:$4 sm:$0xff]  }
 0x155   :  { %2191 = vmatpush1.bf16.msra.mxu1 %v6053_v12  ;;  %v6142_v12 = vld [vmem:[#allocation2 + $0x3ec] ss:$48 sps:$4 sm:$0xff]  }
 0x156   :  { %2192 = vmatprep.subr.bf16.mxu1 %v6061_v13  ;;  %v6172_v13 = vld [vmem:[#allocation7 + $0x1b4] ss:$12 sps:$4 sm:$0xff]  }
 0x159   :  { %2193 = vmatpush1.bf16.msra.mxu1 %v6059_v16  ;;  %v6140_v16 = vld [vmem:[#allocation2 + $0x3e8] ss:$48 sps:$4 sm:$0xff]  }
 0x15a   :  { %2194 = vmatprep.subr.bf16.mxu1 %v6067_v17  ;;  %v6170_v17 = vld [vmem:[#allocation7 + $0x1b0] ss:$12 sps:$4 sm:$0xff]  }
 0x15d   :  { %2195 = vmatpush1.bf16.msra.mxu1 %v6065_v21  ;;  %v388_v21 = vrot.slane %v6790_v43, %v387_v14  ;;  %v6220_v14 = vld [vmem:[#allocation7 + $0x288] ss:$12 sps:$4 sm:$0xff]  }
 0x15e   :  { %2196 = vmatprep.subr.bf16.mxu1 %v6073_v22  ;;  %v392_v22 = vrot.slane %v6790_v43, %v391_v15  ;;  %v6227_v15 = vld [vmem:[#allocation7 + $0x2a4] ss:$12 sps:$4 sm:$0xff]  }
 0x161   :  { %2197 = vmatpush1.bf16.msra.mxu1 %v6071_v25  ;;  %v6148_v25 = vld [vmem:[#allocation2 + $0x4ac] ss:$48 sps:$4 sm:$0xff]  }
 0x162   :  { %2198 = vmatprep.subr.bf16.mxu1 %v6079_v26  ;;  %v6184_v26 = vld [vmem:[#allocation7 + $0x1e4] ss:$12 sps:$4 sm:$0xff]  }
 0x165   :  { %2199 = vmatpush1.bf16.msra.mxu1 %v6077_v27 }
 0x166   :  { %2200 = vmatprep.subr.bf16.mxu1 %v6085_v29 }
 0x169   :  { %2201 = vmatpush1.bf16.msra.mxu1 %v6083_v30 }
 0x16a   :  { %2315 = vmatprep.subr.bf16.mxu1 %v6091_v31 }
 0x16c   :  { %2219 = vmatmul.mubr.bf16.vlgmr.msra.gmra.mrb[8].mxu1 %v6784_v34 }
 0x16d   :  { %2316 = vmatpush1.bf16.msra.mxu1 %v6089_v32  ;;  %2347 = vmatprep.mubr.bf16.mxu1 %v6770_v6  ;;  %v6796_v6 = vsub.s32 1, %v6788_v40 }
 0x16e   :  { %2317 = vmatprep.subr.bf16.mxu1 %v6097_v33  ;;  %v6182_v33 = vld [vmem:[#allocation7 + $0x1e0] ss:$12 sps:$4 sm:$0xff]  }
 0x16f   :  { %v376_v49 = vrot.slane %v6790_v43, %v6796_v6 }
 0x171   :  { %2318 = vmatpush1.bf16.msra.mxu1 %v6095_v35 }
 0x172   :  { %2319 = vmatprep.subr.bf16.mxu1 %v6103_v36 }
 0x175   :  { %2320 = vmatpush1.bf16.msra.mxu1 %v6101_v37 }
 0x176   :  { %2321 = vmatprep.subr.bf16.mxu1 %v6109_v38 }
 0x179   :  { %2322 = vmatpush1.bf16.msra.mxu1 %v6107_v39 }
 0x17a   :  { %2323 = vmatprep.subr.bf16.mxu1 %v6115_v41  ;;  %v6190_v41 = vld [vmem:[#allocation7 + $0x1fc] ss:$12 sps:$4 sm:$0xff]  }
 0x17d   :  { %2324 = vmatpush1.bf16.msra.mxu1 %v6113_v42  ;;  %v6151_v42 = vld [vmem:[#allocation2 + $0x50c] ss:$48 sps:$4 sm:$0xff]  }
 0x17e   :  { %2325 = vmatprep.subr.bf16.mxu1 %v6121_v45 }
 0x17f   :  { %v1962_v50 = vpop.f32.mrb[0].mxu1 }
 0x180   :  { %v5614_v51 = vadd.f32 %v1962_v50, %v372_v47  ;;  %v1964_v52 = vpop.f32.mrb[1].mxu1  ;;  %v6154_v50 = vld [vmem:[#allocation2 + $0x56c] ss:$48 sps:$4 sm:$0xff]  }
 0x181   :  { %v5615_v55 = vadd.f32 %v1964_v52, %v376_v49  ;;  %v1966_v56 = vpop.f32.mrb[2].mxu1  ;;  %2326 = vmatpush1.bf16.msra.mxu1 %v6119_v46  ;;  %v6196_v52 = vld [vmem:[#allocation7 + $0x214] ss:$12 sps:$4 sm:$0xff]  }
 0x182   :  { %v5616_v58 = vadd.f32 %v1966_v56, %v372_v47  ;;  %v1968_v59 = vpop.f32.mrb[3].mxu1  ;;  %2327 = vmatprep.subr.bf16.mxu1 %v6127_v48  ;;  %v2401_v62 = vmax.f32 %v5614_v51, 0.0  ;;  %v6149_v47 = vld [vmem:[#allocation2 + $0x508] ss:$48 sps:$4 sm:$0xff]  }
 0x183   :  { %v5617_v60 = vadd.f32 %v1968_v59, %v376_v49  ;;  %v2402_v0 = vmax.f32 %v5615_v55, 0.0  ;;  %v6188_v49 = vld [vmem:[#allocation7 + $0x1f8] ss:$12 sps:$4 sm:$0xff]   ;;  %v6157_v55 = vld [vmem:[#allocation2 + $0x5cc] ss:$48 sps:$4 sm:$0xff]  }
 0x184   :  { %v2413_v1 = vmax.f32 %v5616_v58, 0.0  ;;  %v6202_v56 = vld [vmem:[#allocation7 + $0x22c] ss:$12 sps:$4 sm:$0xff]   ;;  %v6200_v59 = vld [vmem:[#allocation7 + $0x228] ss:$12 sps:$4 sm:$0xff]  }
 0x185   :  { %v2414_v3 = vmax.f32 %v5617_v60, 0.0  ;;  %2328 = vmatpush1.bf16.msra.mxu1 %v6125_v53  ;;  %v6152_v53 = vld [vmem:[#allocation2 + $0x568] ss:$48 sps:$4 sm:$0xff]   ;;  %v6163_v60 = vld [vmem:[#allocation2 + $0x62c] ss:$48 sps:$4 sm:$0xff]  }
 0x186   :  { %v6802_v57 = vpack.c.bf16 %v2413_v1, %v2401_v62  ;;  %2329 = vmatprep.subr.bf16.mxu1 %v6133_v54  ;;  %v2134_v27 = vpop.f32.mrb[0].mxu0  ;;  %v6194_v54 = vld [vmem:[#allocation7 + $0x210] ss:$12 sps:$4 sm:$0xff]   ;;  %v6206_v62 = vld [vmem:[#allocation7 + $0x240] ss:$12 sps:$4 sm:$0xff]  }
 0x187   :  { %v6804_v18 = vpack.c.bf16 %v2414_v3, %v2402_v0  ;;  %v5622_v29 = vadd.f32 %v2134_v27, %v388_v21  ;;  %v2136_v30 = vpop.f32.mrb[1].mxu0  ;;  %v6155_v58 = vld [vmem:[#allocation2 + $0x5c8] ss:$48 sps:$4 sm:$0xff]   ;;  %v6210_v3 = vld [vmem:[#allocation7 + $0x258] ss:$12 sps:$4 sm:$0xff]  }
 0x188   :  { %v5623_v31 = vadd.f32 %v2136_v30, %v392_v22  ;;  %v2138_v32 = vpop.f32.mrb[2].mxu0  ;;  %v6161_v0 = vld [vmem:[#allocation2 + $0x628] ss:$48 sps:$4 sm:$0xff]   ;;  %v6205_v27 = vld [vmem:[#allocation2 + $0x8cc] ss:$48 sps:$4 sm:$0xff]  }
 0x189   :  { %2330 = vmatpush1.bf16.msra.mxu1 %v6131_v61  ;;  %4406 = vmatprep.mubr.bf16.mxu0 %v6804_v18  ;;  %v2405_v35 = vmax.f32 %v5622_v29, 0.0  ;;  %v5624_v36 = vadd.f32 %v2138_v32, %v388_v21  ;;  %v2140_v37 = vpop.f32.mrb[3].mxu0  ;;  %v6208_v61 = vld [vmem:[#allocation7 + $0x244] ss:$12 sps:$4 sm:$0xff]   ;;  %v6212_v1 = vld [vmem:[#allocation7 + $0x25c] ss:$12 sps:$4 sm:$0xff]  }
 0x18a   :  { %4407 = vmatmul.mubr.bf16.vlgmr.msra.gmra.mrb[8].mxu0 %v6802_v57  ;;  %2331 = vmatprep.subr.bf16.mxu1 %v6136_v2  ;;  %v2406_v38 = vmax.f32 %v5623_v31, 0.0  ;;  %v5625_v39 = vadd.f32 %v2140_v37, %v392_v22  ;;  %v6169_v2 = vld [vmem:[#allocation2 + $0x68c] ss:$48 sps:$4 sm:$0xff]   ;;  %v6230_v21 = vld [vmem:[#allocation7 + $0x2b8] ss:$12 sps:$4 sm:$0xff]  }
 0x18b   :  { %4418 = vmatpush1.bf16.msra.mxu0 %v6158_v5  ;;  %v2417_v45 = vmax.f32 %v5624_v36, 0.0  ;;  %v6175_v5 = vld [vmem:[#allocation2 + $0x6ec] ss:$48 sps:$4 sm:$0xff]   ;;  %v6240_v29 = vld [vmem:[#allocation7 + $0x2e8] ss:$12 sps:$4 sm:$0xff]  }
 0x18c   :  { %4419 = vmatprep.subr.bf16.mxu0 %v6166_v9  ;;  %v2418_v46 = vmax.f32 %v5625_v39, 0.0  ;;  %v6173_v9 = vld [vmem:[#allocation2 + $0x6e8] ss:$48 sps:$4 sm:$0xff]   ;;  %v6199_v22 = vld [vmem:[#allocation2 + $0x86c] ss:$48 sps:$4 sm:$0xff]  }
 0x18d   :  { %2332 = vmatpush1.bf16.msra.mxu1 %v6134_v4  ;;  %v6812_v48 = vpack.c.bf16 %v2417_v45, %v2405_v35  ;;  %v6167_v4 = vld [vmem:[#allocation2 + $0x688] ss:$48 sps:$4 sm:$0xff]   ;;  %v6247_v31 = vld [vmem:[#allocation7 + $0x304] ss:$12 sps:$4 sm:$0xff]   ;;  %v6209_v32 = vld [vmem:[#allocation7 + $0xc8] ss:$12 sps:$4 sm:$0xff]  }
 0x18e   :  { %2333 = vmatprep.subr.bf16.mxu1 %v6139_v8  ;;  %v6814_v51 = vpack.c.bf16 %v2418_v46, %v2406_v38  ;;  %v6217_v8 = vld [vmem:[#allocation7 + $0x274] ss:$12 sps:$4 sm:$0xff]   ;;  %v6203_v30 = vld [vmem:[#allocation2 + $0x8c8] ss:$48 sps:$4 sm:$0xff]   ;;  %v6219_v37 = vld [vmem:[#allocation7 + $0xf8] ss:$12 sps:$4 sm:$0xff]  }
 0x18f   :  { %4420 = vmatpush1.bf16.msra.mxu0 %v6164_v11  ;;  %v6181_v11 = vld [vmem:[#allocation2 + $0x74c] ss:$48 sps:$4 sm:$0xff]   ;;  %v6233_v45 = vld [vmem:[#allocation7 + $0x68] ss:$12 sps:$4 sm:$0xff]  }
 0x190   :  { %4421 = vmatprep.subr.bf16.mxu0 %v6172_v13  ;;  %v6179_v13 = vld [vmem:[#allocation2 + $0x748] ss:$48 sps:$4 sm:$0xff]  }
 0x191   :  { %2334 = vmatpush1.bf16.msra.mxu1 %v6137_v10  ;;  %v6215_v10 = vld [vmem:[#allocation7 + $0x270] ss:$12 sps:$4 sm:$0xff]   ;;  %v6214_v35 = vld [vmem:[#allocation7 + $0xe0] ss:$12 sps:$4 sm:$0xff]  }
 0x192   :  { %2335 = vmatprep.subr.bf16.mxu1 %v6142_v12  ;;  %v6222_v12 = vld [vmem:[#allocation7 + $0x28c] ss:$12 sps:$4 sm:$0xff]   ;;  %v6224_v38 = vld [vmem:[#allocation7 + $0x110] ss:$12 sps:$4 sm:$0xff]  }
 0x193   :  { %4422 = vmatpush1.bf16.msra.mxu0 %v6170_v17  ;;  %v6193_v17 = vld [vmem:[#allocation2 + $0x80c] ss:$48 sps:$4 sm:$0xff]  }
 0x194   :  { %4423 = vmatprep.subr.bf16.mxu0 %v6178_v20  ;;  %v6191_v20 = vld [vmem:[#allocation2 + $0x808] ss:$48 sps:$4 sm:$0xff]  }
 0x195   :  { %2336 = vmatpush1.bf16.msra.mxu1 %v6140_v16  ;;  %v6185_v16 = vld [vmem:[#allocation2 + $0x7a8] ss:$48 sps:$4 sm:$0xff]  }
 0x196   :  { %2337 = vmatprep.subr.bf16.mxu1 %v6145_v19  ;;  %v6232_v19 = vld [vmem:[#allocation7 + $0x2bc] ss:$12 sps:$4 sm:$0xff]   ;;  %v6218_v36 = vld [vmem:[#allocation7 + $0x20] ss:$12 sps:$4 sm:$0xff]  }
 0x197   :  { %4424 = vmatpush1.bf16.msra.mxu0 %v6176_v24  ;;  %v6235_v24 = vld [vmem:[#allocation7 + $0x2d0] ss:$12 sps:$4 sm:$0xff]  }
 0x198   :  { %4425 = vmatprep.subr.bf16.mxu0 %v6184_v26  ;;  %v6242_v26 = vld [vmem:[#allocation7 + $0x2ec] ss:$12 sps:$4 sm:$0xff]   ;;  %v6228_v39 = vld [vmem:[#allocation7 + $0x50] ss:$12 sps:$4 sm:$0xff]  }
 0x199   :  { %2338 = vmatpush1.bf16.msra.mxu1 %v6143_v23  ;;  %v6237_v23 = vld [vmem:[#allocation7 + $0x2d4] ss:$12 sps:$4 sm:$0xff]  }
 0x19a   :  { %2339 = vmatprep.subr.bf16.mxu1 %v6148_v25  ;;  %v6197_v25 = vld [vmem:[#allocation2 + $0x868] ss:$48 sps:$4 sm:$0xff]  }
 0x19b   :  { %4426 = vmatpush1.bf16.msra.mxu0 %v6182_v33  ;;  %v6213_v33 = vld [vmem:[#allocation7 + $0x8] ss:$12 sps:$4 sm:$0xff]  }
 0x19c   :  { %4427 = vmatprep.subr.bf16.mxu0 %v6190_v41  ;;  %v6229_v41 = vld [vmem:[#allocation7 + $0x128] ss:$12 sps:$4 sm:$0xff]  }
 0x19d   :  { %2340 = vmatpush1.bf16.msra.mxu1 %v6146_v28  ;;  %v6223_v28 = vld [vmem:[#allocation7 + $0x38] ss:$12 sps:$4 sm:$0xff]  }
 0x19e   :  { %2341 = vmatprep.subr.bf16.mxu1 %v6151_v42  ;;  %v6821_v42 = vsub.s32 2, %v6788_v40 }
 0x19f   :  { %4428 = vmatpush1.bf16.msra.mxu0 %v6188_v49  ;;  %v6238_v49 = vld [vmem:[#allocation7 + $0x80] ss:$12 sps:$4 sm:$0xff]  }
 0x1a0   :  { %4429 = vmatprep.subr.bf16.mxu0 %v6196_v52  ;;  %v380_v46 = vrot.slane %v6790_v43, %v6821_v42 }
 0x1a1   :  { %2342 = vmatpush1.bf16.msra.mxu1 %v6149_v47 }
 0x1a2   :  { %2343 = vmatprep.subr.bf16.mxu1 %v6154_v50  ;;  %v6239_v50 = vld [vmem:[#allocation7 + $0x158] ss:$12 sps:$4 sm:$0xff]  }
 0x1a3   :  { %4430 = vmatpush1.bf16.msra.mxu0 %v6194_v54 }
 0x1a4   :  { %4431 = vmatprep.subr.bf16.mxu0 %v6202_v56 }
 0x1a5   :  { %2344 = vmatpush1.bf16.msra.mxu1 %v6152_v53 }
 0x1a6   :  { %2345 = vmatprep.subr.bf16.mxu1 %v6157_v55 }
 0x1a7   :  { %4432 = vmatpush1.bf16.msra.mxu0 %v6200_v59 }
 0x1a8   :  { %4433 = vmatprep.subr.bf16.mxu0 %v6208_v61  ;;  %v6244_v61 = vld [vmem:[#allocation7 + $0x170] ss:$12 sps:$4 sm:$0xff]  }
 0x1a9   :  { %2346 = vmatpush1.bf16.msra.mxu1 %v6155_v58  ;;  %v6243_v58 = vld [vmem:[#allocation7 + $0x98] ss:$12 sps:$4 sm:$0xff]  }
 0x1aa   :  { %2358 = vmatprep.subr.bf16.mxu1 %v6163_v60 }
 0x1ab   :  { %4434 = vmatpush1.bf16.msra.mxu0 %v6206_v62 }
 0x1ac   :  { %2348 = vmatmul.mubr.bf16.vlgmr.msra.gmra.mrb[12].mxu1 %v6777_v7  ;;  %4435 = vmatprep.subr.bf16.mxu0 %v6212_v1  ;;  %v6187_v7 = vld [vmem:[#allocation2 + $0x7ac] ss:$48 sps:$4 sm:$0xff]  }
 0x1ad   :  { %2359 = vmatpush1.bf16.msra.mxu1 %v6161_v0  ;;  %2390 = vmatprep.mubr.bf16.mxu1 %v6648_v63  ;;  %v6225_v63 = vld [vmem:[#allocation7 + $0x2a0] ss:$12 sps:$4 sm:$0xff]  }
 0x1ae   :  { %2360 = vmatprep.subr.bf16.mxu1 %v6169_v2 }
 0x1af   :  { %4436 = vmatpush1.bf16.msra.mxu0 %v6210_v3 }
 0x1b0   :  { %4437 = vmatprep.subr.bf16.mxu0 %v6217_v8 }
 0x1b1   :  { %2361 = vmatpush1.bf16.msra.mxu1 %v6167_v4 }
 0x1b2   :  { %2362 = vmatprep.subr.bf16.mxu1 %v6175_v5  ;;  %v6249_v5 = vld [vmem:[#allocation7 + $0x248] ss:$12 sps:$4 sm:$0xff]  }
 0x1b3   :  { %4438 = vmatpush1.bf16.msra.mxu0 %v6215_v10  ;;  %v6252_v10 = vld [vmem:[#allocation7 + $0x31c] ss:$12 sps:$4 sm:$0xff]  }
 0x1b4   :  { %4439 = vmatprep.subr.bf16.mxu0 %v6222_v12  ;;  %v6254_v12 = vld [vmem:[#allocation7 + $0x260] ss:$12 sps:$4 sm:$0xff]  }
 0x1b5   :  { %2363 = vmatpush1.bf16.msra.mxu1 %v6173_v9  ;;  %v6245_v9 = vld [vmem:[#allocation7 + $0x300] ss:$12 sps:$4 sm:$0xff]  }
 0x1b6   :  { %2364 = vmatprep.subr.bf16.mxu1 %v6181_v11  ;;  %v6253_v11 = vld [vmem:[#allocation7 + $0x188] ss:$12 sps:$4 sm:$0xff]  }
 0x1b7   :  { %4440 = vmatpush1.bf16.msra.mxu0 %v6220_v14  ;;  %v6257_v14 = vld [vmem:[#allocation7 + $0x334] ss:$12 sps:$4 sm:$0xff]  }
 0x1b8   :  { %4441 = vmatprep.subr.bf16.mxu0 %v6227_v15  ;;  %v6259_v15 = vld [vmem:[#allocation7 + $0x278] ss:$12 sps:$4 sm:$0xff]  }
 0x1b9   :  { %2365 = vmatpush1.bf16.msra.mxu1 %v6179_v13  ;;  %v6250_v13 = vld [vmem:[#allocation7 + $0x318] ss:$12 sps:$4 sm:$0xff]  }
 0x1ba   :  { %2366 = vmatprep.subr.bf16.mxu1 %v6187_v7  ;;  %v6258_v7 = vld [vmem:[#allocation7 + $0x1a0] ss:$12 sps:$4 sm:$0xff]  }
 0x1bb   :  { %4442 = vmatpush1.bf16.msra.mxu0 %v6225_v63  ;;  %v6255_v63 = vld [vmem:[#allocation7 + $0x330] ss:$12 sps:$4 sm:$0xff]  }
 0x1bc   :  { %4443 = vmatprep.subr.bf16.mxu0 %v6232_v19  ;;  %v6263_v19 = vld [vmem:[#allocation7 + $0x1b8] ss:$12 sps:$4 sm:$0xff]  }
 0x1bd   :  { %2367 = vmatpush1.bf16.msra.mxu1 %v6185_v16  ;;  %v6834_v16 = vld [vmem:[#allocation5 + $0x8] sm:$0xf] }
 0x1be   :  { %2368 = vmatprep.subr.bf16.mxu1 %v6193_v17  ;;  %v6262_v17 = vld [vmem:[#allocation7 + $0x34c] ss:$12 sps:$4 sm:$0xff]  }
 0x1bf   :  { %4444 = vmatpush1.bf16.msra.mxu0 %v6230_v21  ;;  %v408_v21 = vrot.slane %v6834_v16, %v6796_v6 }
 0x1c0   :  { %4445 = vmatprep.subr.bf16.mxu0 %v6237_v23  ;;  %v6267_v23 = vld [vmem:[#allocation7 + $0x364] ss:$12 sps:$4 sm:$0xff]  }
 0x1c1   :  { %2369 = vmatpush1.bf16.msra.mxu1 %v6191_v20  ;;  %v404_v20 = vrot.slane %v6834_v16, %v6793_v44 }
 0x1c2   :  { %2370 = vmatprep.subr.bf16.mxu1 %v6199_v22  ;;  %v6260_v22 = vld [vmem:[#allocation7 + $0x348] ss:$12 sps:$4 sm:$0xff]  }
 0x1c3   :  { %4446 = vmatpush1.bf16.msra.mxu0 %v6235_v24 }
 0x1c4   :  { %4447 = vmatprep.subr.bf16.mxu0 %v6242_v26 }
 0x1c5   :  { %2371 = vmatpush1.bf16.msra.mxu1 %v6197_v25  ;;  %v6268_v25 = vld [vmem:[#allocation7 + $0x1d0] ss:$12 sps:$4 sm:$0xff]  }
 0x1c6   :  { %2372 = vmatprep.subr.bf16.mxu1 %v6205_v27 }
 0x1c7   :  { %4448 = vmatpush1.bf16.msra.mxu0 %v6240_v29  ;;  %v6269_v29 = vld [vmem:[#allocation7 + $0x2a8] ss:$12 sps:$4 sm:$0xff]  }
 0x1c8   :  { %4460 = vmatprep.subr.bf16.mxu0 %v6247_v31 }
 0x1c9   :  { %2373 = vmatpush1.bf16.msra.mxu1 %v6203_v30 }
 0x1ca   :  { %5482 = vmatprep.subr.bf16.mxu1 %v6209_v32  ;;  %v6265_v32 = vld [vmem:[#allocation7 + $0x360] ss:$12 sps:$4 sm:$0xff]  }
 0x1cc   :  { %2391 = vmatmul.mubr.bf16.vlgmr.msra.gmra.mrb[12].mxu1 %v6784_v34  ;;  %v383_v34 = vsub.s32 3, %v6788_v40 }
 0x1cd   :  { %5483 = vmatpush3.bf16.msra.mxu1 %v6213_v33  ;;  %4664 = vmatprep.mubr.bf16.mxu1 %v6804_v18  ;;  %v6234_v18 = vld [vmem:[#allocation7 + $0x140] ss:$12 sps:$4 sm:$0xff]  }
 0x1ce   :  { %5484 = vmatprep.subr.bf16.mxu1 %v6214_v35  ;;  %v384_v47 = vrot.slane %v6790_v43, %v383_v34  ;;  %v6248_v43 = vld [vmem:[#allocation7 + $0xb0] ss:$12 sps:$4 sm:$0xff]  }
 0x1d1   :  { %5485 = vmatpush3.bf16.msra.mxu1 %v6218_v36 }
 0x1d2   :  { %5486 = vmatprep.subr.bf16.mxu1 %v6219_v37  ;;  %v6272_v37 = vld [vmem:[#allocation7 + $0x37c] ss:$12 sps:$4 sm:$0xff]  }
 0x1d5   :  { %5487 = vmatpush3.bf16.msra.mxu1 %v6223_v28 }
 0x1d6   :  { %5488 = vmatprep.subr.bf16.mxu1 %v6224_v38 }
 0x1d9   :  { %5489 = vmatpush3.bf16.msra.mxu1 %v6228_v39  ;;  %v6273_v39 = vld [vmem:[#allocation7 + $0x1e8] ss:$12 sps:$4 sm:$0xff]  }
 0x1da   :  { %5490 = vmatprep.subr.bf16.mxu1 %v6229_v41 }
 0x1dd   :  { %5491 = vmatpush3.bf16.msra.mxu1 %v6233_v45  ;;  %v6274_v45 = vld [vmem:[#allocation7 + $0x2c0] ss:$12 sps:$4 sm:$0xff]  }
 0x1de   :  { %5492 = vmatprep.subr.bf16.mxu1 %v6234_v18 }
 0x1df   :  { %v2048_v52 = vpop.f32.mrb[4].mxu1 }
 0x1e0   :  { %v5618_v53 = vadd.f32 %v2048_v52, %v380_v46  ;;  %v2050_v54 = vpop.f32.mrb[5].mxu1  ;;  %v6278_v52 = vld [vmem:[#allocation7 + $0x200] ss:$12 sps:$4 sm:$0xff]  }
 0x1e1   :  { %v5619_v55 = vadd.f32 %v2050_v54, %v384_v47  ;;  %v2052_v56 = vpop.f32.mrb[6].mxu1  ;;  %5493 = vmatpush3.bf16.msra.mxu1 %v6238_v49  ;;  %v6277_v49 = vld [vmem:[#allocation7 + $0x394] ss:$12 sps:$4 sm:$0xff]   ;;  %v6275_v54 = vld [vmem:[#allocation7 + $0x390] ss:$12 sps:$4 sm:$0xff]  }
 0x1e2   :  { %v5620_v59 = vadd.f32 %v2052_v56, %v380_v46  ;;  %v2054_v60 = vpop.f32.mrb[7].mxu1  ;;  %5494 = vmatprep.subr.bf16.mxu1 %v6239_v50  ;;  %v2403_v0 = vmax.f32 %v5618_v53, 0.0  ;;  %v6270_v46 = vld [vmem:[#allocation7 + $0x378] ss:$12 sps:$4 sm:$0xff]  }
 0x1e3   :  { %v5621_v62 = vadd.f32 %v2054_v60, %v384_v47  ;;  %v2404_v2 = vmax.f32 %v5619_v55, 0.0  ;;  %v6279_v53 = vld [vmem:[#allocation7 + $0x2d8] ss:$12 sps:$4 sm:$0xff]  }
 0x1e4   :  { %v2415_v1 = vmax.f32 %v5620_v59, 0.0  ;;  %v6282_v55 = vld [vmem:[#allocation7 + $0x3ac] ss:$12 sps:$4 sm:$0xff]   ;;  %v6280_v59 = vld [vmem:[#allocation7 + $0x3a8] ss:$12 sps:$4 sm:$0xff]  }
 0x1e5   :  { %v2416_v3 = vmax.f32 %v5621_v62, 0.0  ;;  %5495 = vmatpush3.bf16.msra.mxu1 %v6243_v58  ;;  %v6283_v56 = vld [vmem:[#allocation7 + $0x218] ss:$12 sps:$4 sm:$0xff]   ;;  %v6284_v58 = vld [vmem:[#allocation7 + $0x2f0] ss:$12 sps:$4 sm:$0xff]  }
 0x1e6   :  { %v6829_v4 = vpack.c.bf16 %v2415_v1, %v2403_v0  ;;  %5496 = vmatprep.subr.bf16.mxu1 %v6244_v61  ;;  %v2306_v24 = vpop.f32.mrb[4].mxu0  ;;  %v6287_v60 = vld [vmem:[#allocation7 + $0x3c4] ss:$12 sps:$4 sm:$0xff]   ;;  %v6289_v62 = vld [vmem:[#allocation7 + $0x3c8] ss:$12 sps:$4 sm:$0xff]  }
 0x1e7   :  { %v2428_v8 = vpack.c.bf16 %v2416_v3, %v2404_v2  ;;  %v5630_v26 = vadd.f32 %v2306_v24, %v404_v20  ;;  %v2308_v27 = vpop.f32.mrb[5].mxu0  ;;  %v6288_v61 = vld [vmem:[#allocation7 + $0x230] ss:$12 sps:$4 sm:$0xff]   ;;  %v6285_v0 = vld [vmem:[#allocation7 + $0x3c0] ss:$12 sps:$4 sm:$0xff]  }
 0x1e8   :  { %v5631_v30 = vadd.f32 %v2308_v27, %v408_v21  ;;  %v2310_v31 = vpop.f32.mrb[6].mxu0  ;;  %v6292_v1 = vld [vmem:[#allocation7 + $0x3dc] ss:$12 sps:$4 sm:$0xff]   ;;  %v6294_v3 = vld [vmem:[#allocation7 + $0x3e0] ss:$12 sps:$4 sm:$0xff]  }
 0x1e9   :  { %4449 = vmatprep.mubr.bf16.mxu0 %v2428_v8  ;;  %5497 = vmatpush3.bf16.msra.mxu1 %v6248_v43  ;;  %v2409_v33 = vmax.f32 %v5630_v26, 0.0  ;;  %v5632_v35 = vadd.f32 %v2310_v31, %v404_v20  ;;  %v2312_v36 = vpop.f32.mrb[7].mxu0  ;;  %v6293_v2 = vld [vmem:[#allocation7 + $0x308] ss:$12 sps:$4 sm:$0xff]   ;;  %v6290_v43 = vld [vmem:[#allocation7 + $0x3d8] ss:$12 sps:$4 sm:$0xff]  }
 0x1ea   :  { %4450 = vmatmul.mubr.bf16.vlgmr.msra.gmra.mrb[8].mxu0 %v6829_v4  ;;  %5504 = vmatprep.subr.bf16.mxu1 %v6249_v5  ;;  %v2410_v28 = vmax.f32 %v5631_v30, 0.0  ;;  %v5633_v38 = vadd.f32 %v2312_v36, %v408_v21  ;;  %v6297_v5 = vld [vmem:[#allocation7 + $0x3f4] ss:$12 sps:$4 sm:$0xff]   ;;  %v6310_v20 = vld [vmem:[#allocation7 + $0x438] ss:$12 sps:$4 sm:$0xff]  }
 0x1eb   :  { %4461 = vmatpush1.bf16.msra.mxu0 %v6245_v9  ;;  %4492 = vmatprep.mubr.bf16.mxu0 %v6814_v51  ;;  %v2421_v41 = vmax.f32 %v5632_v35, 0.0  ;;  %v6299_v9 = vld [vmem:[#allocation7 + $0x3f8] ss:$12 sps:$4 sm:$0xff]   ;;  %v6318_v21 = vld [vmem:[#allocation7 + $0x380] ss:$12 sps:$4 sm:$0xff]  }
 0x1ec   :  { %4665 = vmatmul.mubr.bf16.vlgmr.msra.gmra.mrb[16].mxu1 %v6802_v57  ;;  %4462 = vmatprep.subr.bf16.mxu0 %v6252_v10  ;;  %v6264_v57 = vld [vmem:[#allocation7 + $0x290] ss:$12 sps:$4 sm:$0xff]   ;;  %v2422_v18 = vmax.f32 %v5633_v38, 0.0  ;;  %v6322_v24 = vld [vmem:[#allocation7 + $0x46c] ss:$12 sps:$4 sm:$0xff]  }
 0x1ed   :  { %5505 = vmatpush3.bf16.msra.mxu1 %v6253_v11  ;;  %4705 = vmatprep.mubr.bf16.mxu1 %v2428_v8  ;;  %v6840_v47 = vpack.c.bf16 %v2421_v41, %v2409_v33  ;;  %v6298_v8 = vld [vmem:[#allocation7 + $0x320] ss:$12 sps:$4 sm:$0xff]   ;;  %v6295_v10 = vld [vmem:[#allocation7 + $0x3f0] ss:$12 sps:$4 sm:$0xff]   ;;  %v6320_v27 = vld [vmem:[#allocation7 + $0x468] ss:$12 sps:$4 sm:$0xff]  }
 0x1ee   :  { %5506 = vmatprep.subr.bf16.mxu1 %v6254_v12  ;;  %v6842_v50 = vpack.c.bf16 %v2422_v18, %v2410_v28  ;;  %v6302_v11 = vld [vmem:[#allocation7 + $0x40c] ss:$12 sps:$4 sm:$0xff]   ;;  %v6324_v26 = vld [vmem:[#allocation7 + $0x470] ss:$12 sps:$4 sm:$0xff]   ;;  %v6329_v31 = vld [vmem:[#allocation7 + $0x548] ss:$12 sps:$4 sm:$0xff]  }
 0x1ef   :  { %4463 = vmatpush1.bf16.msra.mxu0 %v6250_v13  ;;  %v6303_v12 = vld [vmem:[#allocation7 + $0x338] ss:$12 sps:$4 sm:$0xff]   ;;  %v6304_v13 = vld [vmem:[#allocation7 + $0x410] ss:$12 sps:$4 sm:$0xff]   ;;  %v6333_v35 = vld [vmem:[#allocation7 + $0x488] ss:$12 sps:$4 sm:$0xff]  }
 0x1f0   :  { %4464 = vmatprep.subr.bf16.mxu0 %v6257_v14  ;;  %v6300_v14 = vld [vmem:[#allocation7 + $0x408] ss:$12 sps:$4 sm:$0xff]   ;;  %v6328_v30 = vld [vmem:[#allocation7 + $0x3b0] ss:$12 sps:$4 sm:$0xff]   ;;  %v6334_v36 = vld [vmem:[#allocation7 + $0x560] ss:$12 sps:$4 sm:$0xff]  }
 0x1f1   :  { %5507 = vmatpush3.bf16.msra.mxu1 %v6258_v7  ;;  %v6308_v7 = vld [vmem:[#allocation7 + $0x350] ss:$12 sps:$4 sm:$0xff]   ;;  %v6337_v28 = vld [vmem:[#allocation7 + $0x4b4] ss:$12 sps:$4 sm:$0xff]   ;;  %v6343_v18 = vld [vmem:[#allocation7 + $0x4b8] ss:$12 sps:$4 sm:$0xff]  }
 0x1f2   :  { %5508 = vmatprep.subr.bf16.mxu1 %v6259_v15  ;;  %v6309_v15 = vld [vmem:[#allocation7 + $0x428] ss:$12 sps:$4 sm:$0xff]   ;;  %v6338_v38 = vld [vmem:[#allocation7 + $0x4a0] ss:$12 sps:$4 sm:$0xff]   ;;  %v6335_v41 = vld [vmem:[#allocation7 + $0x4b0] ss:$12 sps:$4 sm:$0xff]  }
 0x1f3   :  { %4465 = vmatpush1.bf16.msra.mxu0 %v6255_v63  ;;  %v6312_v63 = vld [vmem:[#allocation7 + $0x43c] ss:$12 sps:$4 sm:$0xff]  }
 0x1f4   :  { %4466 = vmatprep.subr.bf16.mxu0 %v6262_v17  ;;  %v6313_v17 = vld [vmem:[#allocation7 + $0x368] ss:$12 sps:$4 sm:$0xff]  }
 0x1f5   :  { %5509 = vmatpush3.bf16.msra.mxu1 %v6263_v19  ;;  %v6314_v19 = vld [vmem:[#allocation7 + $0x440] ss:$12 sps:$4 sm:$0xff]   ;;  %v6332_v33 = vld [vmem:[#allocation7 + $0x49c] ss:$12 sps:$4 sm:$0xff]  }
 0x1f6   :  { %5510 = vmatprep.subr.bf16.mxu1 %v6264_v57  ;;  %v6317_v57 = vld [vmem:[#allocation7 + $0x454] ss:$12 sps:$4 sm:$0xff]  }
 0x1f7   :  { %4467 = vmatpush1.bf16.msra.mxu0 %v6260_v22  ;;  %v6319_v22 = vld [vmem:[#allocation7 + $0x458] ss:$12 sps:$4 sm:$0xff]  }
 0x1f8   :  { %4468 = vmatprep.subr.bf16.mxu0 %v6267_v23  ;;  %v6315_v23 = vld [vmem:[#allocation7 + $0x450] ss:$12 sps:$4 sm:$0xff]  }
 0x1f9   :  { %5511 = vmatpush3.bf16.msra.mxu1 %v6268_v25  ;;  %v6323_v25 = vld [vmem:[#allocation7 + $0x398] ss:$12 sps:$4 sm:$0xff]  }
 0x1fa   :  { %5512 = vmatprep.subr.bf16.mxu1 %v6269_v29  ;;  %v6327_v29 = vld [vmem:[#allocation7 + $0x484] ss:$12 sps:$4 sm:$0xff]  }
 0x1fb   :  { %4469 = vmatpush1.bf16.msra.mxu0 %v6265_v32  ;;  %v6325_v32 = vld [vmem:[#allocation7 + $0x480] ss:$12 sps:$4 sm:$0xff]  }
 0x1fc   :  { %4470 = vmatprep.subr.bf16.mxu0 %v6272_v37  ;;  %v6330_v37 = vld [vmem:[#allocation7 + $0x498] ss:$12 sps:$4 sm:$0xff]  }
 0x1fd   :  { %5513 = vmatpush3.bf16.msra.mxu1 %v6273_v39  ;;  %v6339_v39 = vld [vmem:[#allocation7 + $0x578] ss:$12 sps:$4 sm:$0xff]  }
 0x1fe   :  { %5514 = vmatprep.subr.bf16.mxu1 %v6274_v45  ;;  %v6342_v45 = vld [vmem:[#allocation7 + $0x4cc] ss:$12 sps:$4 sm:$0xff]  }
 0x1ff   :  { %4471 = vmatpush1.bf16.msra.mxu0 %v6270_v46  ;;  %v6344_v46 = vld [vmem:[#allocation7 + $0x590] ss:$12 sps:$4 sm:$0xff]  }
 0x200   :  { %4472 = vmatprep.subr.bf16.mxu0 %v6277_v49  ;;  %v6340_v49 = vld [vmem:[#allocation7 + $0x4c8] ss:$12 sps:$4 sm:$0xff]  }
 0x201   :  { %5515 = vmatpush3.bf16.msra.mxu1 %v6278_v52  ;;  %v6347_v52 = vld [vmem:[#allocation7 + $0x4e4] ss:$12 sps:$4 sm:$0xff]  }
 0x202   :  { %5516 = vmatprep.subr.bf16.mxu1 %v6279_v53  ;;  %v6349_v53 = vld [vmem:[#allocation7 + $0x5a8] ss:$12 sps:$4 sm:$0xff]  }
 0x203   :  { %4473 = vmatpush1.bf16.msra.mxu0 %v6275_v54  ;;  %v6345_v54 = vld [vmem:[#allocation7 + $0x4e0] ss:$12 sps:$4 sm:$0xff]  }
 0x204   :  { %4474 = vmatprep.subr.bf16.mxu0 %v6282_v55  ;;  %v6352_v55 = vld [vmem:[#allocation7 + $0x4fc] ss:$12 sps:$4 sm:$0xff]  }
 0x205   :  { %5517 = vmatpush3.bf16.msra.mxu1 %v6283_v56  ;;  %v395_v56 = vsub.s32 6, %v6788_v40 }
 0x206   :  { %5518 = vmatprep.subr.bf16.mxu1 %v6284_v58  ;;  %v6353_v58 = vld [vmem:[#allocation7 + $0x4e8] ss:$12 sps:$4 sm:$0xff]  }
 0x207   :  { %4475 = vmatpush1.bf16.msra.mxu0 %v6280_v59  ;;  %v399_v59 = vsub.s32 7, %v6788_v40  ;;  %v6472_v40 = vld [vmem:[#allocation7 + $0x784] ss:$12 sps:$4 sm:$0xff]  }
 0x208   :  { %4476 = vmatprep.subr.bf16.mxu0 %v6287_v60  ;;  %v6354_v60 = vld [vmem:[#allocation7 + $0x5c0] ss:$12 sps:$4 sm:$0xff]  }
 0x209   :  { %5519 = vmatpush3.bf16.msra.mxu1 %v6288_v61  ;;  %v6350_v61 = vld [vmem:[#allocation7 + $0x4f8] ss:$12 sps:$4 sm:$0xff]  }
 0x20a   :  { %5526 = vmatprep.subr.bf16.mxu1 %v6289_v62  ;;  %v6521_v62 = vld [vmem:[#allocation5] sm:$0xff] }
 0x20b   :  { %4477 = vmatpush1.bf16.msra.mxu0 %v6285_v0  ;;  %v396_v0 = vrot.slane %v6521_v62, %v395_v56  ;;  %v6399_v56 = vld [vmem:[#allocation7 + $0x758] ss:$12 sps:$4 sm:$0xff]  }
 0x20c   :  { %4706 = vmatmul.mubr.bf16.vlgmr.msra.gmra.mrb[20].mxu1 %v6829_v4  ;;  %4478 = vmatprep.subr.bf16.mxu0 %v6292_v1  ;;  %v6307_v4 = vld [vmem:[#allocation7 + $0x424] ss:$12 sps:$4 sm:$0xff]   ;;  %v6357_v1 = vld [vmem:[#allocation7 + $0x514] ss:$12 sps:$4 sm:$0xff]  }
 0x20d   :  { %5527 = vmatpush3.bf16.msra.mxu1 %v6293_v2  ;;  %4746 = vmatprep.mubr.bf16.mxu1 %v6814_v51  ;;  %v6305_v51 = vld [vmem:[#allocation7 + $0x420] ss:$12 sps:$4 sm:$0xff]   ;;  %v400_v2 = vrot.slane %v6521_v62, %v399_v59  ;;  %v6400_v62 = vld [vmem:[#allocation7 + $0x5e8] ss:$12 sps:$4 sm:$0xff]  }
 0x20e   :  { %5528 = vmatprep.subr.bf16.mxu1 %v6294_v3  ;;  %v6358_v3 = vld [vmem:[#allocation7 + $0x500] ss:$12 sps:$4 sm:$0xff]  }
 0x20f   :  { %4479 = vmatpush1.bf16.msra.mxu0 %v6290_v43  ;;  %v6359_v43 = vld [vmem:[#allocation7 + $0x5d8] ss:$12 sps:$4 sm:$0xff]  }
 0x210   :  { %4480 = vmatprep.subr.bf16.mxu0 %v6297_v5  ;;  %v6402_v59 = vld [vmem:[#allocation7 + $0x5ec] ss:$12 sps:$4 sm:$0xff]  }
 0x211   :  { %5529 = vmatpush3.bf16.msra.mxu1 %v6298_v8  ;;  %v6355_v8 = vld [vmem:[#allocation7 + $0x510] ss:$12 sps:$4 sm:$0xff]  }
 0x212   :  { %5530 = vmatprep.subr.bf16.mxu1 %v6299_v9 }
 0x213   :  { %4481 = vmatpush1.bf16.msra.mxu0 %v6295_v10 }
 0x214   :  { %4482 = vmatprep.subr.bf16.mxu0 %v6302_v11  ;;  %v6362_v11 = vld [vmem:[#allocation7 + $0x52c] ss:$12 sps:$4 sm:$0xff]  }
 0x215   :  { %5531 = vmatpush3.bf16.msra.mxu1 %v6303_v12 }
 0x216   :  { %5532 = vmatprep.subr.bf16.mxu1 %v6304_v13 }
 0x217   :  { %4483 = vmatpush1.bf16.msra.mxu0 %v6300_v14  ;;  %v6363_v14 = vld [vmem:[#allocation7 + $0x518] ss:$12 sps:$4 sm:$0xff]  }
 0x218   :  { %4484 = vmatprep.subr.bf16.mxu0 %v6307_v4 }
 0x219   :  { %5533 = vmatpush3.bf16.msra.mxu1 %v6308_v7 }
 0x21a   :  { %5534 = vmatprep.subr.bf16.mxu1 %v6309_v15 }
 0x21b   :  { %4485 = vmatpush1.bf16.msra.mxu0 %v6305_v51  ;;  %v6364_v51 = vld [vmem:[#allocation7 + $0x5f0] ss:$12 sps:$4 sm:$0xff]  }
 0x21c   :  { %4486 = vmatprep.subr.bf16.mxu0 %v6312_v63 }
 0x21d   :  { %5535 = vmatpush3.bf16.msra.mxu1 %v6313_v17  ;;  %v6360_v17 = vld [vmem:[#allocation7 + $0x528] ss:$12 sps:$4 sm:$0xff]  }
 0x21e   :  { %5536 = vmatprep.subr.bf16.mxu1 %v6314_v19 }
 0x21f   :  { %4487 = vmatpush1.bf16.msra.mxu0 %v6310_v20  ;;  %v6367_v20 = vld [vmem:[#allocation7 + $0x544] ss:$12 sps:$4 sm:$0xff]  }
 0x220   :  { %4488 = vmatprep.subr.bf16.mxu0 %v6317_v57 }
 0x221   :  { %5537 = vmatpush3.bf16.msra.mxu1 %v6318_v21 }
 0x222   :  { %5538 = vmatprep.subr.bf16.mxu1 %v6319_v22  ;;  %v6368_v22 = vld [vmem:[#allocation7 + $0x530] ss:$12 sps:$4 sm:$0xff]  }
 0x223   :  { %4489 = vmatpush1.bf16.msra.mxu0 %v6315_v23 }
 0x224   :  { %4490 = vmatprep.subr.bf16.mxu0 %v6322_v24  ;;  %v6369_v24 = vld [vmem:[#allocation7 + $0x6c8] ss:$12 sps:$4 sm:$0xff]  }
 0x225   :  { %5539 = vmatpush3.bf16.msra.mxu1 %v6323_v25 }
 0x226   :  { %5540 = vmatprep.subr.bf16.mxu1 %v6324_v26  ;;  %v6365_v26 = vld [vmem:[#allocation7 + $0x540] ss:$12 sps:$4 sm:$0xff]  }
 0x227   :  { %4491 = vmatpush1.bf16.msra.mxu0 %v6320_v27  ;;  %v6372_v27 = vld [vmem:[#allocation7 + $0x55c] ss:$12 sps:$4 sm:$0xff]  }
 0x228   :  { %4503 = vmatprep.subr.bf16.mxu0 %v6327_v29  ;;  %v6373_v29 = vld [vmem:[#allocation7 + $0x608] ss:$12 sps:$4 sm:$0xff]  }
 0x229   :  { %5541 = vmatpush3.bf16.msra.mxu1 %v6328_v30  ;;  %v6374_v30 = vld [vmem:[#allocation7 + $0x6e0] ss:$12 sps:$4 sm:$0xff]  }
 0x22a   :  { %4493 = vmatmul.mubr.bf16.vlgmr.msra.gmra.mrb[8].mxu0 %v6812_v48  ;;  %5548 = vmatprep.subr.bf16.mxu1 %v6329_v31  ;;  %v6370_v31 = vld [vmem:[#allocation7 + $0x558] ss:$12 sps:$4 sm:$0xff]  }
 0x22b   :  { %4504 = vmatpush1.bf16.msra.mxu0 %v6325_v32  ;;  %v6377_v32 = vld [vmem:[#allocation7 + $0x574] ss:$12 sps:$4 sm:$0xff]  }
 0x22c   :  { %4747 = vmatmul.mubr.bf16.vlgmr.msra.gmra.mrb[24].mxu1 %v6812_v48  ;;  %4505 = vmatprep.subr.bf16.mxu0 %v6332_v33  ;;  %v6348_v48 = vld [vmem:[#allocation7 + $0x4d0] ss:$12 sps:$4 sm:$0xff]   ;;  %v6378_v33 = vld [vmem:[#allocation7 + $0x620] ss:$12 sps:$4 sm:$0xff]  }
 0x22d   :  { %5549 = vmatpush3.bf16.msra.mxu1 %v6333_v35  ;;  %v6379_v35 = vld [vmem:[#allocation7 + $0x6f8] ss:$12 sps:$4 sm:$0xff]  }
 0x22e   :  { %5550 = vmatprep.subr.bf16.mxu1 %v6334_v36  ;;  %v6375_v36 = vld [vmem:[#allocation7 + $0x570] ss:$12 sps:$4 sm:$0xff]  }
 0x22f   :  { %4506 = vmatpush1.bf16.msra.mxu0 %v6330_v37  ;;  %v6382_v37 = vld [vmem:[#allocation7 + $0x58c] ss:$12 sps:$4 sm:$0xff]  }
 0x230   :  { %4507 = vmatprep.subr.bf16.mxu0 %v6337_v28  ;;  %v6383_v28 = vld [vmem:[#allocation7 + $0x638] ss:$12 sps:$4 sm:$0xff]  }
 0x231   :  { %5551 = vmatpush3.bf16.msra.mxu1 %v6338_v38  ;;  %v6384_v38 = vld [vmem:[#allocation7 + $0x710] ss:$12 sps:$4 sm:$0xff]  }
 0x232   :  { %5552 = vmatprep.subr.bf16.mxu1 %v6339_v39  ;;  %v6380_v39 = vld [vmem:[#allocation7 + $0x588] ss:$12 sps:$4 sm:$0xff]  }
 0x233   :  { %4508 = vmatpush1.bf16.msra.mxu0 %v6335_v41  ;;  %v6387_v41 = vld [vmem:[#allocation7 + $0x5a4] ss:$12 sps:$4 sm:$0xff]  }
 0x234   :  { %4509 = vmatprep.subr.bf16.mxu0 %v6342_v45  ;;  %v6388_v45 = vld [vmem:[#allocation7 + $0x650] ss:$12 sps:$4 sm:$0xff]  }
 0x235   :  { %5553 = vmatpush3.bf16.msra.mxu1 %v6343_v18  ;;  %v6389_v18 = vld [vmem:[#allocation7 + $0x728] ss:$12 sps:$4 sm:$0xff]  }
 0x236   :  { %5554 = vmatprep.subr.bf16.mxu1 %v6344_v46  ;;  %v6385_v46 = vld [vmem:[#allocation7 + $0x5a0] ss:$12 sps:$4 sm:$0xff]  }
 0x237   :  { %4510 = vmatpush1.bf16.msra.mxu0 %v6340_v49  ;;  %v6392_v49 = vld [vmem:[#allocation7 + $0x5bc] ss:$12 sps:$4 sm:$0xff]  }
 0x238   :  { %4511 = vmatprep.subr.bf16.mxu0 %v6347_v52  ;;  %v6393_v52 = vld [vmem:[#allocation7 + $0x668] ss:$12 sps:$4 sm:$0xff]  }
 0x239   :  { %5555 = vmatpush3.bf16.msra.mxu1 %v6348_v48  ;;  %v6394_v48 = vld [vmem:[#allocation7 + $0x740] ss:$12 sps:$4 sm:$0xff]  }
 0x23a   :  { %5556 = vmatprep.subr.bf16.mxu1 %v6349_v53  ;;  %v6390_v53 = vld [vmem:[#allocation7 + $0x5b8] ss:$12 sps:$4 sm:$0xff]  }
 0x23b   :  { %4512 = vmatpush1.bf16.msra.mxu0 %v6345_v54  ;;  %v6397_v54 = vld [vmem:[#allocation7 + $0x5d4] ss:$12 sps:$4 sm:$0xff]  }
 0x23c   :  { %4513 = vmatprep.subr.bf16.mxu0 %v6352_v55  ;;  %v6398_v55 = vld [vmem:[#allocation7 + $0x680] ss:$12 sps:$4 sm:$0xff]  }
 0x23d   :  { %5557 = vmatpush3.bf16.msra.mxu1 %v6353_v58  ;;  %v6395_v58 = vld [vmem:[#allocation7 + $0x5d0] ss:$12 sps:$4 sm:$0xff]  }
 0x23e   :  { %5558 = vmatprep.subr.bf16.mxu1 %v6354_v60  ;;  %v6403_v60 = vld [vmem:[#allocation7 + $0x698] ss:$12 sps:$4 sm:$0xff]  }
 0x23f   :  { %4514 = vmatpush1.bf16.msra.mxu0 %v6350_v61  ;;  %v2220_v5 = vpop.f32.mrb[8].mxu1  ;;  %v6404_v61 = vld [vmem:[#allocation7 + $0x770] ss:$12 sps:$4 sm:$0xff]  }
 0x240   :  { %v5626_v9 = vadd.f32 %v2220_v5, %v396_v0  ;;  %v2222_v10 = vpop.f32.mrb[9].mxu1  ;;  %4515 = vmatprep.subr.bf16.mxu0 %v6357_v1  ;;  %v6408_v1 = vld [vmem:[#allocation7 + $0x6b0] ss:$12 sps:$4 sm:$0xff]   ;;  %v6434_v5 = vld [vmem:[#allocation7 + $0x788] ss:$12 sps:$4 sm:$0xff]  }
 0x241   :  { %v5627_v12 = vadd.f32 %v2222_v10, %v400_v2  ;;  %v2224_v13 = vpop.f32.mrb[10].mxu1  ;;  %5559 = vmatpush3.bf16.msra.mxu1 %v6358_v3  ;;  %v6405_v3 = vld [vmem:[#allocation7 + $0x600] ss:$12 sps:$4 sm:$0xff]  }
 0x242   :  { %v2407_v4 = vmax.f32 %v5626_v9, 0.0  ;;  %v5628_v7 = vadd.f32 %v2224_v13, %v396_v0  ;;  %v2226_v15 = vpop.f32.mrb[11].mxu1  ;;  %5560 = vmatprep.subr.bf16.mxu1 %v6359_v43  ;;  %v6407_v0 = vld [vmem:[#allocation7 + $0x604] ss:$12 sps:$4 sm:$0xff]   ;;  %v6411_v43 = vld [vmem:[#allocation7 + $0x61c] ss:$12 sps:$4 sm:$0xff]  }
 0x243   :  { %v5629_v63 = vadd.f32 %v2226_v15, %v400_v2  ;;  %4516 = vmatpush1.bf16.msra.mxu0 %v6355_v8  ;;  %v2408_v57 = vmax.f32 %v5627_v12, 0.0  ;;  %v6433_v2 = vld [vmem:[#allocation7 + $0x848] ss:$12 sps:$4 sm:$0xff]   ;;  %v6438_v8 = vld [vmem:[#allocation7 + $0x860] ss:$12 sps:$4 sm:$0xff]  }
 0x244   :  { %v2419_v19 = vmax.f32 %v5628_v7, 0.0  ;;  %4517 = vmatprep.subr.bf16.mxu0 %v6362_v11  ;;  %v6409_v9 = vld [vmem:[#allocation7 + $0x618] ss:$12 sps:$4 sm:$0xff]   ;;  %v6414_v10 = vld [vmem:[#allocation7 + $0x634] ss:$12 sps:$4 sm:$0xff]  }
 0x245   :  { %v2420_v21 = vmax.f32 %v5629_v63, 0.0  ;;  %5561 = vmatpush3.bf16.msra.mxu1 %v6363_v14  ;;  %v6439_v11 = vld [vmem:[#allocation7 + $0x7a0] ss:$12 sps:$4 sm:$0xff]   ;;  %v6443_v12 = vld [vmem:[#allocation7 + $0x878] ss:$12 sps:$4 sm:$0xff]  }
 0x246   :  { %v6850_v23 = vpack.c.bf16 %v2419_v19, %v2407_v4  ;;  %5562 = vmatprep.subr.bf16.mxu1 %v6364_v51  ;;  %v6412_v13 = vld [vmem:[#allocation7 + $0x630] ss:$12 sps:$4 sm:$0xff]   ;;  %v6417_v14 = vld [vmem:[#allocation7 + $0x64c] ss:$12 sps:$4 sm:$0xff]   ;;  %v6415_v15 = vld [vmem:[#allocation7 + $0x648] ss:$12 sps:$4 sm:$0xff]  }
 0x247   :  { %v2432_v25 = vpack.c.bf16 %v2420_v21, %v2408_v57  ;;  %4518 = vmatpush1.bf16.msra.mxu0 %v6360_v17  ;;  %v6444_v4 = vld [vmem:[#allocation7 + $0x7b8] ss:$12 sps:$4 sm:$0xff]   ;;  %v6448_v7 = vld [vmem:[#allocation7 + $0x890] ss:$12 sps:$4 sm:$0xff]   ;;  %v6453_v63 = vld [vmem:[#allocation7 + $0x8a8] ss:$12 sps:$4 sm:$0xff]  }
 0x248   :  { %4519 = vmatprep.subr.bf16.mxu0 %v6367_v20  ;;  %v6449_v51 = vld [vmem:[#allocation7 + $0x7d0] ss:$12 sps:$4 sm:$0xff]   ;;  %v6418_v17 = vld [vmem:[#allocation7 + $0x660] ss:$12 sps:$4 sm:$0xff]   ;;  %v6454_v20 = vld [vmem:[#allocation7 + $0x7e8] ss:$12 sps:$4 sm:$0xff]  }
 0x249   :  { %4535 = vmatprep.mubr.bf16.mxu0 %v2432_v25  ;;  %5563 = vmatpush3.bf16.msra.mxu1 %v6368_v22  ;;  %v6423_v19 = vld [vmem:[#allocation7 + $0x67c] ss:$12 sps:$4 sm:$0xff]   ;;  %v6458_v57 = vld [vmem:[#allocation7 + $0x8c0] ss:$12 sps:$4 sm:$0xff]   ;;  %v6421_v21 = vld [vmem:[#allocation7 + $0x678] ss:$12 sps:$4 sm:$0xff]  }
 0x24a   :  { %4787 = vmatprep.mubr.bf16.mxu1 %v2432_v25  ;;  %5570 = vmatprep.subr.bf16.mxu1 %v6369_v24  ;;  %v6426_v22 = vld [vmem:[#allocation7 + $0x694] ss:$12 sps:$4 sm:$0xff]   ;;  %v6463_v24 = vld [vmem:[#allocation7 + $0x8d8] ss:$12 sps:$4 sm:$0xff]   ;;  %v6424_v25 = vld [vmem:[#allocation7 + $0x690] ss:$12 sps:$4 sm:$0xff]  }
 0x24b   :  { %4520 = vmatpush1.bf16.msra.mxu0 %v6365_v26  ;;  %v6429_v26 = vld [vmem:[#allocation7 + $0x6ac] ss:$12 sps:$4 sm:$0xff]  }
 0x24c   :  { %4788 = vmatmul.mubr.bf16.vlgmr.msra.gmra.mrb[28].mxu1 %v6850_v23  ;;  %4521 = vmatprep.subr.bf16.mxu0 %v6372_v27  ;;  %v6464_v27 = vld [vmem:[#allocation7 + $0x818] ss:$12 sps:$4 sm:$0xff]  }
 0x24d   :  { %5571 = vmatpush3.bf16.msra.mxu1 %v6373_v29  ;;  %4828 = vmatprep.mubr.bf16.mxu1 %v6842_v50  ;;  %v6468_v29 = vld [vmem:[#allocation7 + $0x8f0] ss:$12 sps:$4 sm:$0xff]  }
 0x24e   :  { %5572 = vmatprep.subr.bf16.mxu1 %v6374_v30  ;;  %v6427_v30 = vld [vmem:[#allocation7 + $0x6a8] ss:$12 sps:$4 sm:$0xff]  }
 0x24f   :  { %4522 = vmatpush1.bf16.msra.mxu0 %v6370_v31  ;;  %v6432_v31 = vld [vmem:[#allocation7 + $0x6c4] ss:$12 sps:$4 sm:$0xff]  }
 0x250   :  { %4523 = vmatprep.subr.bf16.mxu0 %v6377_v32  ;;  %v6469_v32 = vld [vmem:[#allocation7 + $0x830] ss:$12 sps:$4 sm:$0xff]  }
 0x251   :  { %5573 = vmatpush3.bf16.msra.mxu1 %v6378_v33  ;;  %v6430_v33 = vld [vmem:[#allocation7 + $0x6c0] ss:$12 sps:$4 sm:$0xff]  }
 0x252   :  { %5574 = vmatprep.subr.bf16.mxu1 %v6379_v35  ;;  %v6437_v35 = vld [vmem:[#allocation7 + $0x6dc] ss:$12 sps:$4 sm:$0xff]  }
 0x253   :  { %4524 = vmatpush1.bf16.msra.mxu0 %v6375_v36  ;;  %v6435_v36 = vld [vmem:[#allocation7 + $0x6d8] ss:$12 sps:$4 sm:$0xff]  }
 0x254   :  { %4525 = vmatprep.subr.bf16.mxu0 %v6382_v37  ;;  %v6442_v37 = vld [vmem:[#allocation7 + $0x6f4] ss:$12 sps:$4 sm:$0xff]  }
 0x255   :  { %5575 = vmatpush3.bf16.msra.mxu1 %v6383_v28  ;;  %v6440_v28 = vld [vmem:[#allocation7 + $0x6f0] ss:$12 sps:$4 sm:$0xff]  }
 0x256   :  { %5576 = vmatprep.subr.bf16.mxu1 %v6384_v38  ;;  %v6447_v38 = vld [vmem:[#allocation7 + $0x70c] ss:$12 sps:$4 sm:$0xff]  }
 0x257   :  { %4526 = vmatpush1.bf16.msra.mxu0 %v6380_v39  ;;  %v6445_v39 = vld [vmem:[#allocation7 + $0x708] ss:$12 sps:$4 sm:$0xff]  }
 0x258   :  { %4527 = vmatprep.subr.bf16.mxu0 %v6387_v41  ;;  %v6452_v41 = vld [vmem:[#allocation7 + $0x724] ss:$12 sps:$4 sm:$0xff]  }
 0x259   :  { %5577 = vmatpush3.bf16.msra.mxu1 %v6388_v45  ;;  %v6450_v45 = vld [vmem:[#allocation7 + $0x720] ss:$12 sps:$4 sm:$0xff]  }
 0x25a   :  { %5578 = vmatprep.subr.bf16.mxu1 %v6389_v18  ;;  %v6457_v18 = vld [vmem:[#allocation7 + $0x73c] ss:$12 sps:$4 sm:$0xff]  }
 0x25b   :  { %4528 = vmatpush1.bf16.msra.mxu0 %v6385_v46  ;;  %v6455_v46 = vld [vmem:[#allocation7 + $0x738] ss:$12 sps:$4 sm:$0xff]  }
 0x25c   :  { %4529 = vmatprep.subr.bf16.mxu0 %v6392_v49  ;;  %v412_v49 = vrot.slane %v6834_v16, %v6821_v42 }
 0x25d   :  { %5579 = vmatpush3.bf16.msra.mxu1 %v6393_v52  ;;  %v6462_v52 = vld [vmem:[#allocation7 + $0x754] ss:$12 sps:$4 sm:$0xff]  }
 0x25e   :  { %5580 = vmatprep.subr.bf16.mxu1 %v6394_v48  ;;  %v416_v48 = vrot.slane %v6834_v16, %v383_v34 }
 0x25f   :  { %4530 = vmatpush1.bf16.msra.mxu0 %v6390_v53 }
 0x260   :  { %4531 = vmatprep.subr.bf16.mxu0 %v6397_v54  ;;  %v6460_v54 = vld [vmem:[#allocation7 + $0x750] ss:$12 sps:$4 sm:$0xff]  }
 0x261   :  { %5581 = vmatpush3.bf16.msra.mxu1 %v6398_v55 }
 0x262   :  { %5582 = vmatprep.subr.bf16.mxu1 %v6399_v56 }
 0x263   :  { %4532 = vmatpush1.bf16.msra.mxu0 %v6395_v58  ;;  %v6467_v58 = vld [vmem:[#allocation7 + $0x76c] ss:$12 sps:$4 sm:$0xff]  }
 0x264   :  { %4533 = vmatprep.subr.bf16.mxu0 %v6402_v59 }
 0x265   :  { %5583 = vmatpush3.bf16.msra.mxu1 %v6403_v60 }
 0x266   :  { %5584 = vmatprep.subr.bf16.mxu1 %v6404_v61 }
 0x267   :  { %4534 = vmatpush1.bf16.msra.mxu0 %v6400_v62 }
 0x268   :  { %4546 = vmatprep.subr.bf16.mxu0 %v6407_v0 }
 0x269   :  { %5585 = vmatpush3.bf16.msra.mxu1 %v6408_v1 }
 0x26a   :  { %4536 = vmatmul.mubr.bf16.vlgmr.msra.gmra.mrb[8].mxu0 %v6850_v23  ;;  %5592 = vmatprep.subr.bf16.mxu1 %v6433_v2  ;;  %v6459_v23 = vld [vmem:[#allocation7 + $0x800] ss:$12 sps:$4 sm:$0xff]  }
 0x26b   :  { %4547 = vmatpush1.bf16.msra.mxu0 %v6405_v3  ;;  %4578 = vmatprep.mubr.bf16.mxu0 %v6842_v50  ;;  %v6420_v50 = vld [vmem:[#allocation7 + $0x664] ss:$12 sps:$4 sm:$0xff]   ;;  %v6465_v3 = vld [vmem:[#allocation7 + $0x768] ss:$12 sps:$4 sm:$0xff]  }
 0x26c   :  { %4829 = vmatmul.mubr.bf16.vlgmr.msra.gmra.mrb[32].mxu1 %v6840_v47  ;;  %4548 = vmatprep.subr.bf16.mxu0 %v6411_v43 }
 0x26d   :  { %5593 = vmatpush3.bf16.msra.mxu1 %v6434_v5 }
 0x26e   :  { %5594 = vmatprep.subr.bf16.mxu1 %v6438_v8  ;;  %v6470_v8 = vld [vmem:[#allocation7 + $0x780] ss:$12 sps:$4 sm:$0xff]  }
 0x26f   :  { %4549 = vmatpush1.bf16.msra.mxu0 %v6409_v9  ;;  %v6475_v9 = vld [vmem:[#allocation7 + $0x79c] ss:$12 sps:$4 sm:$0xff]  }
 0x270   :  { %4550 = vmatprep.subr.bf16.mxu0 %v6414_v10  ;;  %v6473_v10 = vld [vmem:[#allocation7 + $0x798] ss:$12 sps:$4 sm:$0xff]  }
 0x271   :  { %5595 = vmatpush3.bf16.msra.mxu1 %v6439_v11  ;;  %v6478_v11 = vld [vmem:[#allocation7 + $0x7b4] ss:$12 sps:$4 sm:$0xff]  }
 0x272   :  { %5596 = vmatprep.subr.bf16.mxu1 %v6443_v12  ;;  %v6476_v12 = vld [vmem:[#allocation7 + $0x7b0] ss:$12 sps:$4 sm:$0xff]  }
 0x273   :  { %4551 = vmatpush1.bf16.msra.mxu0 %v6412_v13  ;;  %v6481_v13 = vld [vmem:[#allocation7 + $0x7cc] ss:$12 sps:$4 sm:$0xff]  }
 0x274   :  { %4552 = vmatprep.subr.bf16.mxu0 %v6417_v14  ;;  %v6479_v14 = vld [vmem:[#allocation7 + $0x7c8] ss:$12 sps:$4 sm:$0xff]  }
 0x275   :  { %5597 = vmatpush3.bf16.msra.mxu1 %v6444_v4  ;;  %v6484_v4 = vld [vmem:[#allocation7 + $0x7e4] ss:$12 sps:$4 sm:$0xff]  }
 0x276   :  { %5598 = vmatprep.subr.bf16.mxu1 %v6448_v7  ;;  %v6482_v7 = vld [vmem:[#allocation7 + $0x7e0] ss:$12 sps:$4 sm:$0xff]  }
 0x277   :  { %4553 = vmatpush1.bf16.msra.mxu0 %v6415_v15  ;;  %v6487_v15 = vld [vmem:[#allocation7 + $0x7fc] ss:$12 sps:$4 sm:$0xff]  }
 0x278   :  { %4554 = vmatprep.subr.bf16.mxu0 %v6420_v50  ;;  %v6490_v50 = vld [vmem:[#allocation7 + $0x814] ss:$12 sps:$4 sm:$0xff]  }
 0x279   :  { %5599 = vmatpush3.bf16.msra.mxu1 %v6449_v51 }
 0x27a   :  { %5600 = vmatprep.subr.bf16.mxu1 %v6453_v63  ;;  %v6488_v63 = vld [vmem:[#allocation7 + $0x810] ss:$12 sps:$4 sm:$0xff]  }
 0x27b   :  { %4555 = vmatpush1.bf16.msra.mxu0 %v6418_v17 }
 0x27c   :  { %4556 = vmatprep.subr.bf16.mxu0 %v6423_v19  ;;  %v6493_v19 = vld [vmem:[#allocation7 + $0x82c] ss:$12 sps:$4 sm:$0xff]  }
 0x27d   :  { %5601 = vmatpush3.bf16.msra.mxu1 %v6454_v20 }
 0x27e   :  { %5602 = vmatprep.subr.bf16.mxu1 %v6458_v57 }
 0x27f   :  { %4557 = vmatpush1.bf16.msra.mxu0 %v6421_v21 }
 0x280   :  { %4558 = vmatprep.subr.bf16.mxu0 %v6426_v22 }
 0x281   :  { %5603 = vmatpush3.bf16.msra.mxu1 %v6459_v23  ;;  %v6491_v23 = vld [vmem:[#allocation7 + $0x828] ss:$12 sps:$4 sm:$0xff]  }
 0x282   :  { %5604 = vmatprep.subr.bf16.mxu1 %v6463_v24  ;;  %v6496_v24 = vld [vmem:[#allocation7 + $0x844] ss:$12 sps:$4 sm:$0xff]  }
 0x283   :  { %4559 = vmatpush1.bf16.msra.mxu0 %v6424_v25  ;;  %v6494_v25 = vld [vmem:[#allocation7 + $0x840] ss:$12 sps:$4 sm:$0xff]  }
 0x284   :  { %4560 = vmatprep.subr.bf16.mxu0 %v6429_v26  ;;  %v6499_v26 = vld [vmem:[#allocation7 + $0x85c] ss:$12 sps:$4 sm:$0xff]  }
 0x285   :  { %5605 = vmatpush3.bf16.msra.mxu1 %v6464_v27  ;;  %v6497_v27 = vld [vmem:[#allocation7 + $0x858] ss:$12 sps:$4 sm:$0xff]  }
 0x286   :  { %5606 = vmatprep.subr.bf16.mxu1 %v6468_v29  ;;  %v6502_v29 = vld [vmem:[#allocation7 + $0x874] ss:$12 sps:$4 sm:$0xff]  }
 0x287   :  { %4561 = vmatpush1.bf16.msra.mxu0 %v6427_v30  ;;  %v6500_v30 = vld [vmem:[#allocation7 + $0x870] ss:$12 sps:$4 sm:$0xff]  }
 0x288   :  { %4562 = vmatprep.subr.bf16.mxu0 %v6432_v31  ;;  %v6505_v31 = vld [vmem:[#allocation7 + $0x88c] ss:$12 sps:$4 sm:$0xff]  }
 0x289   :  { %5607 = vmatpush3.bf16.msra.mxu1 %v6469_v32  ;;  %v6503_v32 = vld [vmem:[#allocation7 + $0x888] ss:$12 sps:$4 sm:$0xff]  }
 0x28b   :  { %4563 = vmatpush1.bf16.msra.mxu0 %v6430_v33  ;;  %v6508_v33 = vld [vmem:[#allocation7 + $0x8a4] ss:$12 sps:$4 sm:$0xff]  }
 0x28c   :  { %4564 = vmatprep.subr.bf16.mxu0 %v6437_v35  ;;  %v6506_v35 = vld [vmem:[#allocation7 + $0x8a0] ss:$12 sps:$4 sm:$0xff]  }
 0x28f   :  { %4565 = vmatpush1.bf16.msra.mxu0 %v6435_v36  ;;  %v6511_v36 = vld [vmem:[#allocation7 + $0x8bc] ss:$12 sps:$4 sm:$0xff]  }
 0x290   :  { %4566 = vmatprep.subr.bf16.mxu0 %v6442_v37  ;;  %v2821_v37 = vld [vmem:[#allocation8] sm:$0x7] }
 0x293   :  { %4567 = vmatpush1.bf16.msra.mxu0 %v6440_v28  ;;  %v6509_v28 = vld [vmem:[#allocation7 + $0x8b8] ss:$12 sps:$4 sm:$0xff]  }
 0x294   :  { %4568 = vmatprep.subr.bf16.mxu0 %v6447_v38  ;;  %v6514_v38 = vld [vmem:[#allocation7 + $0x8d4] ss:$12 sps:$4 sm:$0xff]  }
 0x297   :  { %4569 = vmatpush1.bf16.msra.mxu0 %v6445_v39  ;;  %v2834_v39 = vrot.slane %v2821_v37, %v6821_v42 }
 0x298   :  { %4570 = vmatprep.subr.bf16.mxu0 %v6452_v41 }
 0x29b   :  { %4571 = vmatpush1.bf16.msra.mxu0 %v6450_v45  ;;  %v6512_v45 = vld [vmem:[#allocation7 + $0x8d0] ss:$12 sps:$4 sm:$0xff]  }
 0x29c   :  { %4572 = vmatprep.subr.bf16.mxu0 %v6457_v18 }
 0x29f   :  { %4573 = vmatpush1.bf16.msra.mxu0 %v6455_v46  ;;  %v2392_v53 = vpop.f32.mrb[12].mxu1  ;;  %v6517_v46 = vld [vmem:[#allocation7 + $0x8ec] ss:$12 sps:$4 sm:$0xff]  }
 0x2a0   :  { %v5634_v55 = vadd.f32 %v2392_v53, %v412_v49  ;;  %v2394_v56 = vpop.f32.mrb[13].mxu1  ;;  %4574 = vmatprep.subr.bf16.mxu0 %v6462_v52 }
 0x2a1   :  { %v5635_v59 = vadd.f32 %v2394_v56, %v416_v48  ;;  %v2396_v60 = vpop.f32.mrb[14].mxu1 }
 0x2a2   :  { %v2411_v61 = vmax.f32 %v5634_v55, 0.0  ;;  %v5636_v62 = vadd.f32 %v2396_v60, %v412_v49  ;;  %v2398_v0 = vpop.f32.mrb[15].mxu1 }
 0x2a3   :  { %v2412_v1 = vmax.f32 %v5635_v59, 0.0  ;;  %v5637_v2 = vadd.f32 %v2398_v0, %v416_v48  ;;  %4575 = vmatpush1.bf16.msra.mxu0 %v6460_v54 }
 0x2a4   :  { %v2423_v43 = vmax.f32 %v5636_v62, 0.0  ;;  %4576 = vmatprep.subr.bf16.mxu0 %v6467_v58  ;;  %v6515_v58 = vld [vmem:[#allocation7 + $0x8e8] ss:$12 sps:$4 sm:$0xff]  }
 0x2a5   :  { %v2424_v34 = vmax.f32 %v5637_v2, 0.0 }
 0x2a6   :  { %v6862_v16 = vpack.c.bf16 %v2423_v43, %v2411_v61 }
 0x2a7   :  { %v2436_v5 = vpack.c.bf16 %v2424_v34, %v2412_v1  ;;  %4577 = vmatpush1.bf16.msra.mxu0 %v6465_v3 }
 0x2a8   :  { %4589 = vmatprep.subr.bf16.mxu0 %v6472_v40 }
 0x2a9   :  { %4869 = vmatprep.mubr.bf16.mxu1 %v2436_v5 }
 0x2aa   :  { %4579 = vmatmul.mubr.bf16.vlgmr.msra.gmra.mrb[8].mxu0 %v6840_v47  ;;  %4870 = vmatmul.mubr.bf16.vlgmr.msra.gmra.mrb[36].mxu1 %v6862_v16  ;;  %v6485_v47 = vld [vmem:[#allocation7 + $0x7f8] ss:$12 sps:$4 sm:$0xff]  }
 0x2ab   :  { %4590 = vmatpush1.bf16.msra.mxu0 %v6470_v8  ;;  %4621 = vmatprep.mubr.bf16.mxu0 %v2436_v5 }
 0x2ac   :  { %4591 = vmatprep.subr.bf16.mxu0 %v6475_v9 }
 0x2af   :  { %4592 = vmatpush1.bf16.msra.mxu0 %v6473_v10 }
 0x2b0   :  { %4593 = vmatprep.subr.bf16.mxu0 %v6478_v11 }
 0x2b3   :  { %4594 = vmatpush1.bf16.msra.mxu0 %v6476_v12 }
 0x2b4   :  { %4595 = vmatprep.subr.bf16.mxu0 %v6481_v13 }
 0x2b7   :  { %4596 = vmatpush1.bf16.msra.mxu0 %v6479_v14 }
 0x2b8   :  { %4597 = vmatprep.subr.bf16.mxu0 %v6484_v4 }
 0x2bb   :  { %4598 = vmatpush1.bf16.msra.mxu0 %v6482_v7 }
 0x2bc   :  { %4599 = vmatprep.subr.bf16.mxu0 %v6487_v15 }
 0x2bf   :  { %4600 = vmatpush1.bf16.msra.mxu0 %v6485_v47  ;;  %v5498_v51 = vpop.f32.mrb[16].mxu1 }
 0x2c0   :  { %v5499_v17 = vpop.f32.mrb[17].mxu1  ;;  %4601 = vmatprep.subr.bf16.mxu0 %v6490_v50 }
 0x2c1   :  { %v5500_v20 = vadd.f32 %v5499_v17, %v5498_v51  ;;  %v5501_v57 = vpop.f32.mrb[18].mxu1 }
 0x2c2   :  { %v5502_v21 = vpop.f32.mrb[19].mxu1 }
 0x2c3   :  { %4602 = vmatpush1.bf16.msra.mxu0 %v6488_v63  ;;  %v5503_v22 = vadd.f32 %v5502_v21, %v5501_v57  ;;  %v4667_v49 = vadd.f32 %v5500_v20, %v2834_v39 }
 0x2c4   :  { %4603 = vmatprep.subr.bf16.mxu0 %v6493_v19 }
 0x2c5   :  { %v4670_v54 = vadd.f32 %v5503_v22, %v2834_v39  ;;  %v2826_v22 = vrot.slane %v2821_v37, %v6793_v44 }
 0x2c7   :  { %4604 = vmatpush1.bf16.msra.mxu0 %v6491_v23  ;;  %v2830_v23 = vrot.slane %v2821_v37, %v6796_v6 }
 0x2c8   :  { %4605 = vmatprep.subr.bf16.mxu0 %v6496_v24 }
 0x2cb   :  { %4606 = vmatpush1.bf16.msra.mxu0 %v6494_v25 }
 0x2cc   :  { %4607 = vmatprep.subr.bf16.mxu0 %v6499_v26 }
 0x2cf   :  { %4608 = vmatpush1.bf16.msra.mxu0 %v6497_v27 }
 0x2d0   :  { %4609 = vmatprep.subr.bf16.mxu0 %v6502_v29 }
 0x2d3   :  { %4610 = vmatpush1.bf16.msra.mxu0 %v6500_v30 }
 0x2d4   :  { %4611 = vmatprep.subr.bf16.mxu0 %v6505_v31 }
 0x2d7   :  { %4612 = vmatpush1.bf16.msra.mxu0 %v6503_v32 }
 0x2d8   :  { %4613 = vmatprep.subr.bf16.mxu0 %v6508_v33 }
 0x2db   :  { %4614 = vmatpush1.bf16.msra.mxu0 %v6506_v35 }
 0x2dc   :  { %4615 = vmatprep.subr.bf16.mxu0 %v6511_v36 }
 0x2df   :  { %4616 = vmatpush1.bf16.msra.mxu0 %v6509_v28  ;;  %v5520_v41 = vpop.f32.mrb[20].mxu1 }
 0x2e0   :  { %v5521_v18 = vpop.f32.mrb[21].mxu1  ;;  %4617 = vmatprep.subr.bf16.mxu0 %v6514_v38 }
 0x2e1   :  { %v5522_v52 = vadd.f32 %v5521_v18, %v5520_v41  ;;  %v5523_v48 = vpop.f32.mrb[22].mxu1 }
 0x2e2   :  { %v5524_v53 = vpop.f32.mrb[23].mxu1 }
 0x2e3   :  { %v4708_v55 = vadd.f32 %v5522_v52, %v4667_v49  ;;  %4618 = vmatpush1.bf16.msra.mxu0 %v6512_v45  ;;  %v5525_v56 = vadd.f32 %v5524_v53, %v5523_v48 }
 0x2e4   :  { %4619 = vmatprep.subr.bf16.mxu0 %v6517_v46 }
 0x2e5   :  { %v4711_v59 = vadd.f32 %v5525_v56, %v4670_v54 }
 0x2e7   :  { %4620 = vmatpush1.bf16.msra.mxu0 %v6515_v58 }
 0x2ea   :  { %4622 = vmatmul.mubr.bf16.vlgmr.msra.gmra.mrb[8].mxu0 %v6862_v16 }
 0x2ff   :  { %v5542_v42 = vpop.f32.mrb[24].mxu1 }
 0x300   :  { %v5543_v60 = vpop.f32.mrb[25].mxu1 }
 0x301   :  { %v5544_v61 = vadd.f32 %v5543_v60, %v5542_v42  ;;  %v5545_v62 = vpop.f32.mrb[26].mxu1 }
 0x302   :  { %v5546_v0 = vpop.f32.mrb[27].mxu1 }
 0x303   :  { %v4749_v1 = vadd.f32 %v5544_v61, %v4708_v55  ;;  %v5547_v2 = vadd.f32 %v5546_v0, %v5545_v62 }
 0x305   :  { %v4752_v3 = vadd.f32 %v5547_v2, %v4711_v59 }
 0x31f   :  { %v5564_v43 = vpop.f32.mrb[28].mxu1 }
 0x320   :  { %v5565_v40 = vpop.f32.mrb[29].mxu1 }
 0x321   :  { %v5566_v34 = vadd.f32 %v5565_v40, %v5564_v43  ;;  %v5567_v5 = vpop.f32.mrb[30].mxu1 }
 0x322   :  { %v5568_v8 = vpop.f32.mrb[31].mxu1 }
 0x323   :  { %v4790_v9 = vadd.f32 %v5566_v34, %v4749_v1  ;;  %v5569_v10 = vadd.f32 %v5568_v8, %v5567_v5 }
 0x325   :  { %v4793_v11 = vadd.f32 %v5569_v10, %v4752_v3 }
 0x33f   :  { %v5586_v12 = vpop.f32.mrb[32].mxu1 }
 0x340   :  { %v5587_v13 = vpop.f32.mrb[33].mxu1 }
 0x341   :  { %v5588_v14 = vadd.f32 %v5587_v13, %v5586_v12  ;;  %v5589_v16 = vpop.f32.mrb[34].mxu1 }
 0x342   :  { %v5590_v4 = vpop.f32.mrb[35].mxu1 }
 0x343   :  { %v4831_v7 = vadd.f32 %v5588_v14, %v4790_v9  ;;  %v5591_v15 = vadd.f32 %v5590_v4, %v5589_v16 }
 0x345   :  { %v4834_v47 = vadd.f32 %v5591_v15, %v4793_v11 }
 0x37d   :  { %v5608_v50 = vpop.f32.mrb[36].mxu1 }
 0x37e   :  { %v5609_v51 = vpop.f32.mrb[37].mxu1 }
 0x37f   :  { %v5610_v63 = vadd.f32 %v5609_v51, %v5608_v50  ;;  %v5611_v17 = vpop.f32.mrb[38].mxu1 }
 0x380   :  { %v5612_v19 = vpop.f32.mrb[39].mxu1 }
 0x381   :  { %v4872_v20 = vadd.f32 %v5610_v63, %v4831_v7  ;;  %v5613_v57 = vadd.f32 %v5612_v19, %v5611_v17 }
 0x383   :  { %4880 = vst [vmem:[#allocation10 + $0x10] sm:$0xff] %v4872_v20  ;;  %v4875_v21 = vadd.f32 %v5613_v57, %v4834_v47 }
 0x385   :  { %4883 = vst [vmem:[#allocation10 + $0x28] sm:$0xff] %v4875_v21 }
 0x3bd   :  { %v4623_v24 = vpop.f32.mrb[8].mxu0 }
 0x3be   :  { %v5638_v25 = vadd.f32 %v4623_v24, %v2826_v22  ;;  %v4625_v26 = vpop.f32.mrb[9].mxu0 }
 0x3bf   :  { %v5639_v27 = vadd.f32 %v4625_v26, %v2830_v23  ;;  %v4627_v29 = vpop.f32.mrb[10].mxu0 }
 0x3c0   :  { %4878 = vst [vmem:[#allocation10] sm:$0xff] %v5638_v25  ;;  %v5640_v30 = vadd.f32 %v4627_v29, %v2826_v22  ;;  %v4629_v31 = vpop.f32.mrb[11].mxu0 }
 0x3c1   :  { %4879 = vst [vmem:[#allocation10 + $0x8] sm:$0xff] %v5639_v27  ;;  %v5641_v32 = vadd.f32 %v4629_v31, %v2830_v23 }
 0x3c2   :  { %4881 = vst [vmem:[#allocation10 + $0x18] sm:$0xff] %v5640_v30 }
 0x3c3   :  { %4882 = vst [vmem:[#allocation10 + $0x20] sm:$0xff] %v5641_v32 }
 0x3c4   :  { %6621 = shalt.err (!%p6618_p8)
}
 0x3c5   :  { %s6622_s6 = scalar_lea.hbm %s6887_s5, 768 }
 0x3c6   :  { %p6623_p9 = scmp.ne.s32.totalorder %s6887_s5, %s6622_s6  ;;  %p6626_p10 = scmp.lt.u32.totalorder %s6622_s6, %s6887_s5 }
 0x3c8   :  { %p6628_p11 = pnand %p6626_p10, %p6623_p9 }
 0x3ca   :  { %6631 = shalt.err (!%p6628_p11)
}
 0x3cb   :  { %s6650_s11 = smov 384   ;;  %s6651_s12 = smov 24  }
 0x3cc   :  { %4895 = dma.vmem_to_hbm [thread:$0]  %s4890_s1, 768, %s6887_s5, [#allocation4], %s6650_s11, %s6650_s11, %s6651_s12  }
 0x3cd   :  { %6638 = dma.done.wait [#allocation4], 768  }
 0x3ce   :  { %6639 = vsyncadd [#allocation4], 4294966528 }
 0x3cf   :  { %4899 = vsyncpa [#allocation3], 1 }
 0x3d0   :  { %4900 = vsyncpa [#allocation6], 1 }
 0x3d1   :  { %4901 = vsyncpa [#allocation9], 1 }
 0x3d2   :  { %4902 = vsyncpa [#allocation4], 1 }

</bundles_post_ra>
